<compile_context>
chip_gen: v7x
topology: tpu7x:2x2x1
jax: 0.10.0
libtpu: 0.0.40
codegen_flags: <defaults>
</compile_context>

<pallas_src>
import functools

import jax
import jax.numpy as jnp
from jax import lax
from jax.experimental import pallas as pl
from jax.experimental.pallas import tpu as pltpu

_LANE = 128


# ---------------------------------------------------------------------------
# Helpers
# ---------------------------------------------------------------------------
def _pad_axis(x, axis, mult):
    size = x.shape[axis]
    pad = (-size) % mult
    if pad == 0:
        return x
    widths = [(0, 0)] * x.ndim
    widths[axis] = (0, pad)
    return jnp.pad(x, widths)


def _vmem_capacity_bytes():
    try:
        return int(pltpu.get_tpu_info().vmem_capacity_bytes)
    except Exception:
        return 64 * 1024 * 1024  # conservative (v7x per-core)


def _masked_log_softmax(z, n_valid):
    """log_softmax over the last axis, ignoring padded lanes >= n_valid."""
    col = lax.broadcasted_iota(jnp.int32, z.shape, z.ndim - 1)
    zm = jnp.where(col < n_valid, z, -jnp.inf)
    m = jnp.max(zm, axis=-1, keepdims=True)
    lse = m + jnp.log(jnp.sum(jnp.exp(zm - m), axis=-1, keepdims=True))
    return z - lse  # padded lanes are finite garbage, sliced away by caller


# ---------------------------------------------------------------------------
# Fused kernel: MLP + all k APPNP hops + log_softmax in ONE pallas_call
#   grid = (k_hops,)  ("arbitrary": sequential dependence through Z scratch)
# ---------------------------------------------------------------------------
def _fused_appnp_kernel(attr_ref, w1_ref, w2t_ref, adj_ref, out_ref,
                        x0_ref, z_ref, *, alpha, n_classes):
    hop = pl.program_id(0)

    @pl.when(hop == 0)
    def _():
        # lin1 + ReLU + lin2 (dropout is identity in eval mode).
        h = jnp.dot(attr_ref[...], w1_ref[...],
                    preferred_element_type=jnp.float32)
        h = jnp.maximum(h, 0.0)
        x0 = jnp.dot(h, w2t_ref[...], preferred_element_type=jnp.float32)
        x0_ref[...] = x0
        z_ref[...] = x0

    # One APPNP hop per grid step: Z <- (1-α) Â Z + α X0
    z = ((1.0 - alpha) * jnp.dot(adj_ref[...], z_ref[...],
                                 preferred_element_type=jnp.float32)
         + alpha * x0_ref[...])
    z_ref[...] = z

    @pl.when(hop == pl.num_programs(0) - 1)
    def _():
        out_ref[...] = _masked_log_softmax(z, n_classes).astype(out_ref.dtype)


def _fused_forward(attr_p, adj_p, w1_p, w2t_p, *, k_hops, alpha, n_classes,
                   vmem_limit):
    np_, dp = attr_p.shape
    hp, cp = w2t_p.shape
    kernel = functools.partial(_fused_appnp_kernel, alpha=float(alpha),
                               n_classes=n_classes)
    return pl.pallas_call(
        kernel,
        out_shape=jax.ShapeDtypeStruct((np_, cp), jnp.float32),
        grid_spec=pltpu.PrefetchScalarGridSpec(
            num_scalar_prefetch=0,
            grid=(k_hops,),
            in_specs=[
                pl.BlockSpec((np_, dp), lambda h: (0, 0)),   # A, resident
                pl.BlockSpec((dp, hp), lambda h: (0, 0)),    # W1, resident
                pl.BlockSpec((hp, cp), lambda h: (0, 0)),    # W2^T, resident
                pl.BlockSpec((np_, np_), lambda h: (0, 0)),  # Â, resident
            ],
            out_specs=pl.BlockSpec((np_, cp), lambda h: (0, 0)),
            scratch_shapes=[
                pltpu.VMEM((np_, cp), jnp.float32),  # X0
                pltpu.VMEM((np_, cp), jnp.float32),  # Z
            ],
        ),
        compiler_params=pltpu.CompilerParams(
            dimension_semantics=("arbitrary",),
            vmem_limit_bytes=vmem_limit,
        ),
    )(attr_p, w1_p, w2t_p, adj_p)


# ---------------------------------------------------------------------------
# Streaming fallback (Â does not fit VMEM): row-block per-hop kernels
# ---------------------------------------------------------------------------
def _mlp_kernel(a_ref, w1_ref, w2t_ref, out_ref):
    h = jnp.dot(a_ref[...], w1_ref[...], preferred_element_type=jnp.float32)
    h = jnp.maximum(h, 0.0)
    out_ref[...] = jnp.dot(h, w2t_ref[...],
                           preferred_element_type=jnp.float32
                           ).astype(out_ref.dtype)


def _feature_mlp(attr_p, w1_p, w2t_p, *, tm, vmem_limit):
    np_, dp = attr_p.shape
    hp, cp = w2t_p.shape
    return pl.pallas_call(
        _mlp_kernel,
        out_shape=jax.ShapeDtypeStruct((np_, cp), jnp.float32),
        grid_spec=pltpu.PrefetchScalarGridSpec(
            num_scalar_prefetch=0,
            grid=(np_ // tm,),
            in_specs=[
                pl.BlockSpec((tm, dp), lambda i: (i, 0)),  # A row block
                pl.BlockSpec((dp, hp), lambda i: (0, 0)),  # W1 resident
                pl.BlockSpec((hp, cp), lambda i: (0, 0)),  # W2^T resident
            ],
            out_specs=pl.BlockSpec((tm, cp), lambda i: (i, 0)),
        ),
        compiler_params=pltpu.CompilerParams(
            dimension_semantics=("parallel",),
            vmem_limit_bytes=vmem_limit,
        ),
    )(attr_p, w1_p, w2t_p)


def _hop_kernel(adj_ref, z_ref, x0_ref, out_ref, *, alpha, fuse_log_softmax,
                n_classes):
    # adj_ref may be bf16 (halved HBM stream); accumulate in f32 either way.
    z_state = z_ref[...].astype(adj_ref.dtype)
    z = (1.0 - alpha) * jnp.dot(adj_ref[...], z_state,
                                preferred_element_type=jnp.float32)
    z = z + alpha * x0_ref[...]
    if fuse_log_softmax:
        z = _masked_log_softmax(z, n_classes)
    out_ref[...] = z.astype(out_ref.dtype)


def _appnp_hop(adj_s, z, x0, *, alpha, fuse_log_softmax, n_classes, tm,
               vmem_limit):
    np_ = adj_s.shape[0]
    cp = x0.shape[1]
    kernel = functools.partial(_hop_kernel, alpha=float(alpha),
                               fuse_log_softmax=fuse_log_softmax,
                               n_classes=n_classes)
    # TODO(synk): for very large n on v7x (64 MiB VMEM), add a K-tile grid axis
    # with an f32 accumulator instead of a full (tm, n) adjacency row block.
    return pl.pallas_call(
        kernel,
        out_shape=jax.ShapeDtypeStruct((np_, cp), jnp.float32),
        grid_spec=pltpu.PrefetchScalarGridSpec(
            num_scalar_prefetch=0,
            grid=(np_ // tm,),
            in_specs=[
                pl.BlockSpec((tm, np_), lambda i: (i, 0)),  # Â row block (streamed)
                pl.BlockSpec((np_, cp), lambda i: (0, 0)),  # Z state, resident
                pl.BlockSpec((tm, cp), lambda i: (i, 0)),   # X0 block
            ],
            out_specs=pl.BlockSpec((tm, cp), lambda i: (i, 0)),
        ),
        compiler_params=pltpu.CompilerParams(
            dimension_semantics=("parallel",),
            vmem_limit_bytes=vmem_limit,
        ),
    )(adj_s, z, x0)


# ---------------------------------------------------------------------------
# Wrapper: full APPNPNet forward (eval mode)
# ---------------------------------------------------------------------------
def preprocess(attr_idx, edge_idx, n, d):
    """Glue: densify the sparse attribute matrix and build the gcn-normalized
    adjacency (A + I self loops, symmetric D^-1/2 normalization)."""
    attr_dense = jnp.zeros((n, d), jnp.float32).at[attr_idx[0], attr_idx[1]].max(1.0)
    adj = jnp.zeros((n, n), jnp.float32).at[edge_idx[0], edge_idx[1]].max(1.0)
    adj = jnp.maximum(adj, adj.T)                  # undirected
    adj = adj + jnp.eye(n, dtype=jnp.float32)      # gcn_norm adds self loops (A + I)
    dinv = lax.rsqrt(adj.sum(axis=1))              # deg >= 1, no eps needed
    adj_norm = adj * dinv[:, None] * dinv[None, :]
    # TODO(synk): the original repo's APPNP propagation normalization may differ
    # slightly (e.g. explicit self-loop edge weights); gcn_norm assumed here.
    return attr_dense, adj_norm


def appnp_net_forward(attr_dense, adj_norm, w1, w2, *, k_hops, alpha, tm=128,
                      force_streaming=False, stream_adj_dtype=jnp.float32):
    assert k_hops >= 1
    n, d = attr_dense.shape
    c, h = w2.shape
    assert w1.shape == (d, h) and adj_norm.shape == (n, n)

    # One-time layout plumbing: pre-transpose W2 (C,H)->(H,C), zero-pad all
    # lane dims (d, H, C) to multiples of 128 and n to a multiple of tm.
    w2t = w2.T
    attr_p = _pad_axis(attr_dense, 1, _LANE)
    w1_p = _pad_axis(_pad_axis(w1, 0, _LANE), 1, _LANE)
    w2t_p = _pad_axis(_pad_axis(w2t, 0, _LANE), 1, _LANE)
    attr_p = _pad_axis(attr_p, 0, tm)
    adj_p = _pad_axis(_pad_axis(adj_norm, 0, tm), 1, tm)

    np_, dp = attr_p.shape
    hp, cp = w2t_p.shape

    cap = _vmem_capacity_bytes()
    vmem_limit = int(min(0.8 * cap, 100 * 1024 * 1024))
    # Conservative fused-path VMEM estimate (2x on inputs for buffering).
    fused_bytes = (2 * 4 * (np_ * np_ + np_ * dp + dp * hp + hp * cp)
                   + 2 * 4 * 3 * np_ * cp)
    use_fused = (not force_streaming) and fused_bytes <= int(0.45 * cap)

    if use_fused:
        out_p = _fused_forward(attr_p, adj_p, w1_p, w2t_p, k_hops=k_hops,
                               alpha=alpha, n_classes=c, vmem_limit=vmem_limit)
    else:
        x0 = _feature_mlp(attr_p, w1_p, w2t_p, tm=tm, vmem_limit=vmem_limit)
        adj_s = adj_p.astype(stream_adj_dtype)  # bf16 for large n halves HBM bytes
        z = x0
        for hop in range(k_hops):
            z = _appnp_hop(adj_s, z, x0, alpha=alpha,
                           fuse_log_softmax=(hop == k_hops - 1),
                           n_classes=c, tm=tm, vmem_limit=vmem_limit)
        out_p = z

    return out_p[:n, :c]


def _reference(attr_dense, adj_norm, w1, w2, k_hops, alpha):
    x0 = jnp.maximum(attr_dense @ w1, 0.0) @ w2.T
    z = x0
    for _ in range(k_hops):
        z = (1.0 - alpha) * (adj_norm @ z) + alpha * x0
    return jax.nn.log_softmax(z, axis=1)


if __name__ == "__main__":
    key = jax.random.PRNGKey(0)
    k1, k2, k3, k4, k5, k6 = jax.random.split(key, 6)

    # Small shapes consistent with the module.
    n, d, n_hidden, n_classes = 256, 64, 64, 16
    k_hops, alpha = 3, 0.1
    nnz_attr, n_edges = 1024, 1024
    tm = 128

    # Deterministic weights (kaiming-like uniform bounds).
    b1 = (6.0 / d) ** 0.5
    w1 = jax.random.uniform(k1, (d, n_hidden), jnp.float32, -b1, b1)          # SparseLinear.weight (in, out)
    b2 = (1.0 / n_hidden) ** 0.5
    w2 = jax.random.uniform(k2, (n_classes, n_hidden), jnp.float32, -b2, b2)  # nn.Linear.weight (out, in)

    # Sparse attribute / edge indices (values implicitly 1).
    attr_idx = jnp.stack([jax.random.randint(k3, (nnz_attr,), 0, n),
                          jax.random.randint(k4, (nnz_attr,), 0, d)], axis=0)
    edge_idx = jnp.stack([jax.random.randint(k5, (n_edges,), 0, n),
                          jax.random.randint(k6, (n_edges,), 0, n)], axis=0)

    attr_dense, adj_norm = preprocess(attr_idx, edge_idx, n, d)
    ref = _reference(attr_dense, adj_norm, w1, w2, k_hops, alpha)

    # Primary (fused single-call) path.
    out = appnp_net_forward(attr_dense, adj_norm, w1, w2,
                            k_hops=k_hops, alpha=alpha, tm=tm)
    out = jax.block_until_ready(out)
    assert out.shape == (n, n_classes)
    err = float(jnp.max(jnp.abs(out - ref)))
    assert jnp.allclose(out, ref, atol=1e-4, rtol=1e-4), \
        f"fused path mismatch vs reference, max abs err {err}"
    assert jnp.allclose(jnp.sum(jnp.exp(out), axis=1), 1.0, atol=1e-4)

    # Streaming fallback path (used when Â does not fit VMEM) — validated too.
    out_s = appnp_net_forward(attr_dense, adj_norm, w1, w2,
                              k_hops=k_hops, alpha=alpha, tm=tm,
                              force_streaming=True)
    out_s = jax.block_until_ready(out_s)
    err_s = float(jnp.max(jnp.abs(out_s - ref)))
    assert jnp.allclose(out_s, ref, atol=1e-4, rtol=1e-4), \
        f"streaming path mismatch vs reference, max abs err {err_s}"

    print("KERNEL_OK")
</pallas_src>

<mosaic_0001>
module attributes {stable_mosaic.version = 11 : i64} {
  func.func @_fused_appnp_kernel(%arg0: i32, %arg1: memref<256x128xf32, #tpu.memory_space<vmem>>, %arg2: memref<128x128xf32, #tpu.memory_space<vmem>>, %arg3: memref<128x128xf32, #tpu.memory_space<vmem>>, %arg4: memref<256x256xf32, #tpu.memory_space<vmem>>, %arg5: memref<256x128xf32, #tpu.memory_space<vmem>>, %arg6: memref<256x128xf32, #tpu.memory_space<vmem>>, %arg7: memref<256x128xf32, #tpu.memory_space<vmem>>) attributes {dimension_semantics = [#tpu.dimension_semantics<arbitrary>], iteration_bounds = array<i64: 3>, scalar_prefetch = 0 : i64, scratch_operands = 2 : i64, tpu.core_type = #tpu.core_type<tc>, window_params = [{pipeline_mode = #tpu.pipeline_mode<synchronous>, transform_indices = @transform_0, window_bounds = array<i64: 256, 128>}, {pipeline_mode = #tpu.pipeline_mode<synchronous>, transform_indices = @transform_1, window_bounds = array<i64: 128, 128>}, {pipeline_mode = #tpu.pipeline_mode<synchronous>, transform_indices = @transform_2, window_bounds = array<i64: 128, 128>}, {pipeline_mode = #tpu.pipeline_mode<synchronous>, transform_indices = @transform_3, window_bounds = array<i64: 256, 256>}, {pipeline_mode = #tpu.pipeline_mode<synchronous>, transform_indices = @transform_4, window_bounds = array<i64: 256, 128>}]} {
    %c0_i32 = arith.constant 0 : i32
    %0 = arith.cmpi eq, %arg0, %c0_i32 : i32
    %1 = arith.extui %0 : i1 to i32
    %c0_i32_0 = arith.constant 0 : i32
    %2 = arith.cmpi ne, %1, %c0_i32_0 : i32
    scf.if %2 {
      %c0_11 = arith.constant 0 : index
      %c0_12 = arith.constant 0 : index
      %16 = vector.load %arg1[%c0_11, %c0_12] : memref<256x128xf32, #tpu.memory_space<vmem>>, vector<256x128xf32>
      %c0_13 = arith.constant 0 : index
      %c0_14 = arith.constant 0 : index
      %17 = vector.load %arg2[%c0_13, %c0_14] : memref<128x128xf32, #tpu.memory_space<vmem>>, vector<128x128xf32>
      %cst_15 = arith.constant dense<0.000000e+00> : vector<256x128xf32>
      %18 = tpu.matmul %16, %17, %cst_15 {dimension_numbers = #tpu.dot_dimension_numbers<[1], [0], [0], [1], [0, 0, 1, 1], [], []>} : vector<256x128xf32>, vector<128x128xf32>, vector<256x128xf32> -> vector<256x128xf32>
      %cst_16 = arith.constant 0.000000e+00 : f32
      %19 = vector.broadcast %cst_16 : f32 to vector<256x128xf32>
      %20 = arith.maximumf %18, %19 : vector<256x128xf32>
      %c0_17 = arith.constant 0 : index
      %c0_18 = arith.constant 0 : index
      %21 = vector.load %arg3[%c0_17, %c0_18] : memref<128x128xf32, #tpu.memory_space<vmem>>, vector<128x128xf32>
      %cst_19 = arith.constant dense<0.000000e+00> : vector<256x128xf32>
      %22 = tpu.matmul %20, %21, %cst_19 {dimension_numbers = #tpu.dot_dimension_numbers<[1], [0], [0], [1], [0, 0, 1, 1], [], []>} : vector<256x128xf32>, vector<128x128xf32>, vector<256x128xf32> -> vector<256x128xf32>
      %c0_20 = arith.constant 0 : index
      %c0_21 = arith.constant 0 : index
      %23 = vector.load %arg6[%c0_20, %c0_21] : memref<256x128xf32, #tpu.memory_space<vmem>>, vector<256x128xf32>
      tpu.vector_store %arg6[%c0_20, %c0_21], %22 {strides = array<i32>} : memref<256x128xf32, #tpu.memory_space<vmem>>, vector<256x128xf32>,
      %c0_22 = arith.constant 0 : index
      %c0_23 = arith.constant 0 : index
      %24 = vector.load %arg7[%c0_22, %c0_23] : memref<256x128xf32, #tpu.memory_space<vmem>>, vector<256x128xf32>
      tpu.vector_store %arg7[%c0_22, %c0_23], %22 {strides = array<i32>} : memref<256x128xf32, #tpu.memory_space<vmem>>, vector<256x128xf32>,
    } else {
    }
    %c0 = arith.constant 0 : index
    %c0_1 = arith.constant 0 : index
    %3 = vector.load %arg4[%c0, %c0_1] : memref<256x256xf32, #tpu.memory_space<vmem>>, vector<256x256xf32>
    %c0_2 = arith.constant 0 : index
    %c0_3 = arith.constant 0 : index
    %4 = vector.load %arg7[%c0_2, %c0_3] : memref<256x128xf32, #tpu.memory_space<vmem>>, vector<256x128xf32>
    %cst = arith.constant dense<0.000000e+00> : vector<256x128xf32>
    %5 = tpu.matmul %3, %4, %cst {dimension_numbers = #tpu.dot_dimension_numbers<[1], [0], [0], [1], [0, 0, 1, 1], [], []>} : vector<256x256xf32>, vector<256x128xf32>, vector<256x128xf32> -> vector<256x128xf32>
    %cst_4 = arith.constant 0.899999976 : f32
    %6 = vector.broadcast %cst_4 : f32 to vector<256x128xf32>
    %7 = arith.mulf %6, %5 : vector<256x128xf32>
    %c0_5 = arith.constant 0 : index
    %c0_6 = arith.constant 0 : index
    %8 = vector.load %arg6[%c0_5, %c0_6] : memref<256x128xf32, #tpu.memory_space<vmem>>, vector<256x128xf32>
    %cst_7 = arith.constant 1.000000e-01 : f32
    %9 = vector.broadcast %cst_7 : f32 to vector<256x128xf32>
    %10 = arith.mulf %9, %8 : vector<256x128xf32>
    %11 = arith.addf %7, %10 : vector<256x128xf32>
    %c0_8 = arith.constant 0 : index
    %c0_9 = arith.constant 0 : index
    %12 = vector.load %arg7[%c0_8, %c0_9] : memref<256x128xf32, #tpu.memory_space<vmem>>, vector<256x128xf32>
    tpu.vector_store %arg7[%c0_8, %c0_9], %11 {strides = array<i32>} : memref<256x128xf32, #tpu.memory_space<vmem>>, vector<256x128xf32>,
    %c2_i32 = arith.constant 2 : i32
    %13 = arith.cmpi eq, %arg0, %c2_i32 : i32
    %14 = arith.extui %13 : i1 to i32
    %c0_i32_10 = arith.constant 0 : i32
    %15 = arith.cmpi ne, %14, %c0_i32_10 : i32
    scf.if %15 {
      %16 = tpu.iota {dimensions = array<i32: 1>} : vector<256x128xi32>
      %c16_i32 = arith.constant 16 : i32
      %17 = vector.broadcast %c16_i32 : i32 to vector<256x128xi32>
      %18 = arith.cmpi slt, %16, %17 : vector<256x128xi32>
      %cst_11 = arith.constant 0xFF800000 : f32
      %19 = vector.broadcast %cst_11 : f32 to vector<256x128xf32>
      %20 = arith.select %18, %11, %19 : vector<256x128xi1>, vector<256x128xf32>
      %cst_12 = arith.constant dense<0xFF800000> : vector<256xf32>
      %21 = vector.multi_reduction <maximumf>, %20, %cst_12 [1] : vector<256x128xf32> to vector<256xf32>
      %22 = vector.shape_cast %21 : vector<256xf32> to vector<256x1xf32>
      %23 = vector.broadcast %22 : vector<256x1xf32> to vector<256x128xf32>
      %24 = arith.subf %20, %23 : vector<256x128xf32>
      %25 = math.exp %24 : vector<256x128xf32>
      %cst_13 = arith.constant dense<0.000000e+00> : vector<256xf32>
      %26 = vector.multi_reduction <add>, %25, %cst_13 [1] : vector<256x128xf32> to vector<256xf32>
      %27 = vector.shape_cast %26 : vector<256xf32> to vector<256x1xf32>
      %28 = math.log %27 : vector<256x1xf32>
      %29 = arith.addf %22, %28 : vector<256x1xf32>
      %30 = vector.broadcast %29 : vector<256x1xf32> to vector<256x128xf32>
      %31 = arith.subf %11, %30 : vector<256x128xf32>
      %c0_14 = arith.constant 0 : index
      %c0_15 = arith.constant 0 : index
      %32 = vector.load %arg5[%c0_14, %c0_15] : memref<256x128xf32, #tpu.memory_space<vmem>>, vector<256x128xf32>
      tpu.vector_store %arg5[%c0_14, %c0_15], %31 {strides = array<i32>} : memref<256x128xf32, #tpu.memory_space<vmem>>, vector<256x128xf32>,
    } else {
    }
    return
  }
  func.func @transform_0(%arg0: i32) -> (i32, i32) {
    %c0_i32 = arith.constant 0 : i32
    %c0_i32_0 = arith.constant 0 : i32
    %c0_i32_1 = arith.constant 0 : i32
    return %c0_i32, %c0_i32_0 : i32, i32
  }
  func.func @transform_1(%arg0: i32) -> (i32, i32) {
    %c0_i32 = arith.constant 0 : i32
    %c0_i32_0 = arith.constant 0 : i32
    %c0_i32_1 = arith.constant 0 : i32
    return %c0_i32, %c0_i32_0 : i32, i32
  }
  func.func @transform_2(%arg0: i32) -> (i32, i32) {
    %c0_i32 = arith.constant 0 : i32
    %c0_i32_0 = arith.constant 0 : i32
    %c0_i32_1 = arith.constant 0 : i32
    return %c0_i32, %c0_i32_0 : i32, i32
  }
  func.func @transform_3(%arg0: i32) -> (i32, i32) {
    %c0_i32 = arith.constant 0 : i32
    %c0_i32_0 = arith.constant 0 : i32
    %c0_i32_1 = arith.constant 0 : i32
    return %c0_i32, %c0_i32_0 : i32, i32
  }
  func.func @transform_4(%arg0: i32) -> (i32, i32) {
    %c0_i32 = arith.constant 0 : i32
    %c0_i32_0 = arith.constant 0 : i32
    %c0_i32_1 = arith.constant 0 : i32
    return %c0_i32, %c0_i32_0 : i32, i32
  }
}

</mosaic_0001>

<bundles_post_ra>
// kernel: tpu_custom_call.1
= control target key start
LH: loop header
LB: loop body
LE: loop exit
PB: predicated region body
PF: predicated region fallthrough
CT: control target
= control target key end

     0   :  { %9 = vsyncpa [#allocation5], 0  ;;  %s3318_s0 = inlined_call_operand.hbm [shape: f32[256,128], index: 0, kind: input, shape index: {}]   ;;  %s3319_s1 = inlined_call_operand.hbm [shape: f32[128,128], index: 1, kind: input, shape index: {}]   ;;  %s3320_s2 = inlined_call_operand.hbm [shape: f32[128,128], index: 2, kind: input, shape index: {}]   ;;  %s3321_s3 = inlined_call_operand.hbm [shape: f32[256,256], index: 3, kind: input, shape index: {}]   ;;  %s3322_s4 = inlined_call_operand.hbm [shape: f32[256,128], index: 4, kind: output, shape index: {}]  }
   0x1   :  { %10 = vsyncpa [#allocation8], 0 }
   0x2   :  { %11 = vsyncpa [#allocation11], 0 }
   0x3   :  { %12 = vsyncpa [#allocation6], 0  ;;  %s2625_s15 = smov 0  }
   0x4 LB: > { %s2631_s16 = sadd.s32 4294967295, %s2586_s15   ;;  %p1819_p0 = scmp.ge.s32.totalorder %s2586_s15, 1  ;;  %s2586_s15 = sphi %s2625_s15, %s18_s15  }
   0x5   : > { %p128_p1 = scmp.lt.s32.totalorder %s2586_s15, 4  ;;  %p3323_p3 = scmp.eq.s32.totalorder %s2631_s16, 0 }
   0x6   : > { %s2588_s18 = smov [#allocation7]   ;;  %s2589_s20 = smov [#allocation4]  }
   0x7   : > { %p2637_p4 = pnand %p1819_p0, %p128_p1  ;;  %s153_s19 = sshll.u32 %s2588_s18, 4  ;;  %s2641_s19 = int_to_ptr.vmem [resolvable:$true] %s153_s19 }
   0x8   : > { %s140_s21 = sshll.u32 %s2589_s20, 4  ;;  %s2590_s23 = smov [#allocation9]   ;;  %s2645_s21 = int_to_ptr.vmem [resolvable:$true] %s140_s21 }
   0x9   : > { %s3340_s17 = scalar_select %p2637_p4, 1, 0 }
   0xa   : > { %p2255_p5 = pneg %p2637_p4  ;;  %s166_s24 = sshll.u32 %s2590_s23, 4  ;;  %s2653_s24 = int_to_ptr.vmem [resolvable:$true] %s166_s24 }
   0xb   : > { %s2591_s25 = smov [#allocation10]   ;;  %s2426_s29 = scalar_lea.hbm %s3319_s1, 2048 }
   0xc   : > { %p2649_p6 = pnand %p3323_p3, %p2255_p5  ;;  %s2655_s26 = sshll.u32 %s2591_s25, 4  ;;  %s180_s26 = int_to_ptr.vmem [resolvable:$true] %s2655_s26 }
   0xd   : > { %p2427_p7 = scmp.ne.s32.totalorder %s3319_s1, %s2426_s29  ;;  %p2433_p11 = scmp.lt.u32.totalorder %s2426_s29, %s3319_s1 }
   0xe   : > { %p2665_p8 = pneg %p2649_p6 }
  0x10   : > { %p2429_p9 = pnand %p2665_p8, %p2427_p7 }
  0x12   : > { %p2430_p10 = pneg %p2429_p9 }
  0x14   : > { %p2435_p12 = pnand %p2433_p11, %p2430_p10 }
  0x16   : > { %2438 = shalt.err (!%p2435_p12)
}
  0x17   : > { %s2439_s9 = scalar_lea.vmem %s2641_s19, 2048  ;;  %p2447_p5 = scmp.lt.s32.totalorder %s2641_s19, %s2641_s19 }
  0x18   : > { %p2440_p13 = scmp.ne.s32.totalorder %s2641_s19, %s2439_s9  ;;  %p2448_p2 = scmp.lt.s32.totalorder %s2439_s9, %s2439_s9 }
  0x1a   : > { %p2442_p0 = pnand %p2440_p13, %p2665_p8  ;;  %p2449_p7 = por %p2448_p2, %p2447_p5 }
  0x1c   : > { %p2443_p1 = pneg %p2442_p0 }
  0x1e   : > { %p2450_p9 = pnand %p2449_p7, %p2443_p1 }
  0x20   : > { %2453 = shalt.err (!%p2450_p9)
}
  0x21   : > { %s2592_s10 = smov 128   ;;  %s2593_s11 = smov 8  }
  0x22   : > { %2261 = dma.hbm_to_vmem [thread:$0]  (!%p2649_p6), %s3319_s1, 2048, %s2641_s19, [#allocation8], %s2592_s10, %s2592_s10, %s2593_s11  }
  0x23   : > { %s2454_s20 = scalar_lea.hbm %s3318_s0, 4096 }
  0x24   : > { %p2455_p2 = scmp.ne.s32.totalorder %s3318_s0, %s2454_s20  ;;  %p2461_p12 = scmp.lt.u32.totalorder %s2454_s20, %s3318_s0 }
  0x26   : > { %p2457_p10 = pnand %p2455_p2, %p2665_p8 }
  0x28   : > { %p2458_p11 = pneg %p2457_p10 }
  0x2a   : > { %p2463_p13 = pnand %p2461_p12, %p2458_p11 }
  0x2c   : > { %2466 = shalt.err (!%p2463_p13)
}
  0x2d   : > { %s2467_s19 = scalar_lea.vmem %s2645_s21, 4096  ;;  %p2475_p7 = scmp.lt.s32.totalorder %s2645_s21, %s2645_s21 }
  0x2e   : > { %p2468_p0 = scmp.ne.s32.totalorder %s2645_s21, %s2467_s19  ;;  %p2476_p9 = scmp.lt.s32.totalorder %s2467_s19, %s2467_s19 }
  0x30   : > { %p2470_p1 = pnand %p2468_p0, %p2665_p8  ;;  %p2477_p2 = por %p2476_p9, %p2475_p7 }
  0x32   : > { %p2471_p5 = pneg %p2470_p1 }
  0x34   : > { %p2478_p10 = pnand %p2477_p2, %p2471_p5 }
  0x36   : > { %2481 = shalt.err (!%p2478_p10)
}
  0x37   : > { %2258 = dma.hbm_to_vmem [thread:$0]  (!%p2649_p6), %s3318_s0, 4096, %s2645_s21, [#allocation5], %s2592_s10, %s2592_s10, %s2593_s11  }
  0x38   : > { %s2482_s8 = scalar_lea.hbm %s3320_s2, 2048 }
  0x39   : > { %p2483_p11 = scmp.ne.s32.totalorder %s3320_s2, %s2482_s8  ;;  %p2489_p0 = scmp.lt.u32.totalorder %s2482_s8, %s3320_s2 }
  0x3b   : > { %p2485_p12 = pnand %p2483_p11, %p2665_p8 }
  0x3d   : > { %p2486_p13 = pneg %p2485_p12 }
  0x3f   : > { %p2491_p1 = pnand %p2489_p0, %p2486_p13 }
  0x41   : > { %2494 = shalt.err (!%p2491_p1)
}
  0x42   : > { %s2495_s21 = scalar_lea.vmem %s2653_s24, 2048  ;;  %p2503_p2 = scmp.lt.s32.totalorder %s2653_s24, %s2653_s24 }
  0x43   : > { %p2496_p5 = scmp.ne.s32.totalorder %s2653_s24, %s2495_s21  ;;  %p2504_p10 = scmp.lt.s32.totalorder %s2495_s21, %s2495_s21 }
  0x45   : > { %p2498_p7 = pnand %p2496_p5, %p2665_p8  ;;  %p2505_p11 = por %p2504_p10, %p2503_p2 }
  0x47   : > { %p2499_p9 = pneg %p2498_p7 }
  0x49   : > { %p2506_p12 = pnand %p2505_p11, %p2499_p9 }
  0x4b   : > { %2509 = shalt.err (!%p2506_p12)
}
  0x4c   : > { %2264 = dma.hbm_to_vmem [thread:$0]  (!%p2649_p6), %s3320_s2, 2048, %s2653_s24, [#allocation8], %s2592_s10, %s2592_s10, %s2593_s11  }
  0x4d   : > { %s2510_s27 = scalar_lea.hbm %s3321_s3, 8192 }
  0x4e   : > { %p2511_p13 = scmp.ne.s32.totalorder %s3321_s3, %s2510_s27  ;;  %p2517_p5 = scmp.lt.u32.totalorder %s2510_s27, %s3321_s3 }
  0x50   : > { %p2513_p0 = pnand %p2511_p13, %p2665_p8 }
  0x52   : > { %p2514_p1 = pneg %p2513_p0 }
  0x54   : > { %p2519_p7 = pnand %p2517_p5, %p2514_p1 }
  0x56   : > { %2522 = shalt.err (!%p2519_p7)
}
  0x57   : > { %s2523_s5 = scalar_lea.vmem %s180_s26, 8192  ;;  %p2531_p11 = scmp.lt.s32.totalorder %s180_s26, %s180_s26 }
  0x58   : > { %p2524_p9 = scmp.ne.s32.totalorder %s180_s26, %s2523_s5  ;;  %p2532_p12 = scmp.lt.s32.totalorder %s2523_s5, %s2523_s5 }
  0x5a   : > { %p2526_p2 = pnand %p2524_p9, %p2665_p8  ;;  %p2533_p3 = por %p2532_p12, %p2531_p11 }
  0x5c   : > { %p2527_p10 = pneg %p2526_p2 }
  0x5e   : > { %p2534_p4 = pnand %p2533_p3, %p2527_p10 }
  0x60   : > { %2537 = shalt.err (!%p2534_p4)
}
  0x61   : > { %s2594_s24 = smov 256   ;;  %s2595_s10 = smov 16  }
  0x62   : > { %2267 = dma.hbm_to_vmem [thread:$0]  (!%p2649_p6), %s3321_s3, 8192, %s180_s26, [#allocation11], %s2594_s24, %s2594_s24, %s2595_s10  }
  0x63   : > { %p3343_p13 = scmp.ne.s32.totalorder %s3340_s17, 0 }
  0x65   : > { %195 = sbr.rel (%p3343_p13) target bundleno = 1400 (0x578), region = 36 }
  0x6c   : > { %p3344_p0 = scmp.eq.s32.totalorder %s2631_s16, 0 }
  0x6e   : > { %2569 = dma.done.wait (%p3344_p0), [#allocation5], 4096   ;;  %p3345_p8 = pmov %p3344_p0 }
  0x6f   : > { %p3346_p3 = pmov %p3344_p0 }
  0x70   : > { %2571 = vsyncadd (%p3345_p8), [#allocation5], 4294963200 }
  0x71   : > { %2573 = dma.done.wait (%p3346_p3), [#allocation8], 4096   ;;  %p3347_p4 = pmov %p3344_p0 }
  0x72   : > { %p3348_p1 = pmov %p3344_p0 }
  0x73   : > { %2575 = vsyncadd (%p3347_p4), [#allocation8], 4294963200 }
  0x74   : > { %2577 = dma.done.wait (%p3348_p1), [#allocation11], 8192   ;;  %p3349_p6 = pmov %p3344_p0 }
  0x75   : > { %p3350_p5 = scmp.ne.s32.totalorder %s2631_s16, 0 }
  0x76   : > { %2579 = vsyncadd (%p3349_p6), [#allocation11], 4294959104  ;;  %v259_v0 = vld [vmem:[#allocation7] sm:$0xff] (!%p3350_p5)  ;;  %v260_v1 = vld [vmem:[#allocation7 + $0x8] sm:$0xff] (!%p3350_p5) }
  0x77   : > { %226 = sbr.rel (%p3350_p5) target bundleno = 643 (0x283), region = 56  ;;  %v261_v2 = vld [vmem:[#allocation7 + $0x10] sm:$0xff] (!%p3350_p5)  ;;  %v2091_v3 = vpack.c.bf16 (!%p3350_p5), %v260_v1, %v259_v0  ;;  %v262_v4 = vld [vmem:[#allocation7 + $0x18] sm:$0xff] (!%p3350_p5)  ;;  %v263_v6 = vld [vmem:[#allocation7 + $0x20] sm:$0xff] (!%p3350_p5) }
  0x78   : > { %v2095_v5 = vpack.c.bf16 (!%p3350_p5), %v262_v4, %v261_v2  ;;  %v264_v7 = vld [vmem:[#allocation7 + $0x28] sm:$0xff] (!%p3350_p5)  ;;  %v227_v9 = vld [vmem:[#allocation4] sm:$0xff] (!%p3350_p5)  ;;  %v265_v10 = vld [vmem:[#allocation7 + $0x30] sm:$0xff] (!%p3350_p5) }
  0x79   : > { %2092 = vmatprep.subr.bf16.mxu0 (!%p3350_p5), %v2091_v3  ;;  %v2099_v8 = vpack.c.bf16 (!%p3350_p5), %v264_v7, %v263_v6  ;;  %v266_v11 = vld [vmem:[#allocation7 + $0x38] sm:$0xff] (!%p3350_p5)  ;;  %1963 = vmatprep.mubr.f32.mxu0 (!%p3350_p5), %v227_v9  ;;  %v267_v13 = vld [vmem:[#allocation7 + $0x40] sm:$0xff] (!%p3350_p5)  ;;  %v268_v14 = vld [vmem:[#allocation7 + $0x48] sm:$0xff] (!%p3350_p5) }
  0x7a   : > { %2094 = vmatpush3.bf16.msra.mxu0 (!%p3350_p5), %v2091_v3  ;;  %v2103_v12 = vpack.c.bf16 (!%p3350_p5), %v266_v11, %v265_v10  ;;  %v2107_v15 = vpack.c.bf16 (!%p3350_p5), %v268_v14, %v267_v13  ;;  %v269_v16 = vld [vmem:[#allocation7 + $0x50] sm:$0xff] (!%p3350_p5)  ;;  %v270_v17 = vld [vmem:[#allocation7 + $0x58] sm:$0xff] (!%p3350_p5)  ;;  %v532_v18 = vld [vmem:[#allocation9] sm:$0xff] (!%p3350_p5) }
  0x7b   : > { %2096 = vmatprep.subr.bf16.mxu0 (!%p3350_p5), %v2095_v5  ;;  %v533_v19 = vld [vmem:[#allocation9 + $0x8] sm:$0xff] (!%p3350_p5)  ;;  %v534_v20 = vld [vmem:[#allocation9 + $0x10] sm:$0xff] (!%p3350_p5)  ;;  %v2111_v21 = vpack.c.bf16 (!%p3350_p5), %v270_v17, %v269_v16  ;;  %v271_v22 = vld [vmem:[#allocation7 + $0x60] sm:$0xff] (!%p3350_p5) }
  0x7c   : > { %v2123_v23 = vpack.c.bf16 (!%p3350_p5), %v533_v19, %v532_v18  ;;  %v535_v24 = vld [vmem:[#allocation9 + $0x18] sm:$0xff] (!%p3350_p5)  ;;  %v272_v25 = vld [vmem:[#allocation7 + $0x68] sm:$0xff] (!%p3350_p5)  ;;  %v536_v27 = vld [vmem:[#allocation9 + $0x20] sm:$0xff] (!%p3350_p5) }
  0x7d   : > { %v2127_v26 = vpack.c.bf16 (!%p3350_p5), %v535_v24, %v534_v20  ;;  %v537_v28 = vld [vmem:[#allocation9 + $0x28] sm:$0xff] (!%p3350_p5)  ;;  %v2115_v29 = vpack.c.bf16 (!%p3350_p5), %v272_v25, %v271_v22  ;;  %v273_v30 = vld [vmem:[#allocation7 + $0x70] sm:$0xff] (!%p3350_p5)  ;;  %v274_v32 = vld [vmem:[#allocation7 + $0x78] sm:$0xff] (!%p3350_p5) }
  0x7e   : > { %2098 = vmatpush3.bf16.msra.mxu0 %v2095_v5  ;;  %2124 = vmatprep.subr.bf16.mxu1 %v2123_v23  ;;  %v2131_v31 = vpack.c.bf16 %v537_v28, %v536_v27  ;;  %v538_v33 = vld [vmem:[#allocation9 + $0x30] sm:$0xff]  ;;  %v539_v34 = vld [vmem:[#allocation9 + $0x38] sm:$0xff]  ;;  %v2119_v35 = vpack.c.bf16 %v274_v32, %v273_v30  ;;  %v540_v37 = vld [vmem:[#allocation9 + $0x40] sm:$0xff] }
  0x7f   : > { %2100 = vmatprep.subr.bf16.mxu0 %v2099_v8  ;;  %2126 = vmatpush3.bf16.msra.mxu1 %v2123_v23  ;;  %v2135_v36 = vpack.c.bf16 %v539_v34, %v538_v33  ;;  %v541_v38 = vld [vmem:[#allocation9 + $0x48] sm:$0xff]  ;;  %v542_v40 = vld [vmem:[#allocation9 + $0x50] sm:$0xff]  ;;  %v543_v41 = vld [vmem:[#allocation9 + $0x58] sm:$0xff] }
  0x80   : > { %2128 = vmatprep.subr.bf16.mxu1 %v2127_v26  ;;  %v2139_v39 = vpack.c.bf16 %v541_v38, %v540_v37  ;;  %v228_v42 = vld [vmem:[#allocation4 + $0x8] sm:$0xff]  ;;  %v229_v43 = vld [vmem:[#allocation4 + $0x10] sm:$0xff]  ;;  %v2143_v44 = vpack.c.bf16 %v543_v41, %v542_v40  ;;  %v544_v45 = vld [vmem:[#allocation9 + $0x60] sm:$0xff] }
  0x81   : > { %v545_v46 = vld [vmem:[#allocation9 + $0x68] sm:$0xff]  ;;  %v230_v47 = vld [vmem:[#allocation4 + $0x18] sm:$0xff]  ;;  %v231_v48 = vld [vmem:[#allocation4 + $0x20] sm:$0xff] }
  0x82   : > { %2102 = vmatpush3.bf16.msra.mxu0 %v2099_v8  ;;  %v2147_v49 = vpack.c.bf16 %v545_v46, %v544_v45  ;;  %v232_v50 = vld [vmem:[#allocation4 + $0x28] sm:$0xff]  ;;  %v233_v51 = vld [vmem:[#allocation4 + $0x30] sm:$0xff]  ;;  %v234_v52 = vld [vmem:[#allocation4 + $0x38] sm:$0xff] }
  0x83   : > { %2104 = vmatprep.subr.bf16.mxu0 %v2103_v12  ;;  %2130 = vmatpush3.bf16.msra.mxu1 %v2127_v26  ;;  %v235_v53 = vld [vmem:[#allocation4 + $0x40] sm:$0xff]  ;;  %v236_v54 = vld [vmem:[#allocation4 + $0x48] sm:$0xff]  ;;  %v237_v55 = vld [vmem:[#allocation4 + $0x50] sm:$0xff] }
  0x84   : > { %2132 = vmatprep.subr.bf16.mxu1 %v2131_v31  ;;  %v238_v56 = vld [vmem:[#allocation4 + $0x58] sm:$0xff]  ;;  %v239_v57 = vld [vmem:[#allocation4 + $0x60] sm:$0xff]  ;;  %v240_v58 = vld [vmem:[#allocation4 + $0x68] sm:$0xff] }
  0x85   : > { %v241_v59 = vld [vmem:[#allocation4 + $0x70] sm:$0xff]  ;;  %v242_v60 = vld [vmem:[#allocation4 + $0x78] sm:$0xff]  ;;  %v243_v61 = vld [vmem:[#allocation4 + $0x80] sm:$0xff] }
  0x86   : > { %2106 = vmatpush3.bf16.msra.mxu0 %v2103_v12  ;;  %v244_v62 = vld [vmem:[#allocation4 + $0x88] sm:$0xff]  ;;  %v245_v63 = vld [vmem:[#allocation4 + $0x90] sm:$0xff]  ;;  %v246_v0 = vld [vmem:[#allocation4 + $0x98] sm:$0xff] }
  0x87   : > { %2108 = vmatprep.subr.bf16.mxu0 %v2107_v15  ;;  %2134 = vmatpush3.bf16.msra.mxu1 %v2131_v31  ;;  %v247_v1 = vld [vmem:[#allocation4 + $0xa0] sm:$0xff]  ;;  %v248_v2 = vld [vmem:[#allocation4 + $0xa8] sm:$0xff]  ;;  %v249_v3 = vld [vmem:[#allocation4 + $0xb0] sm:$0xff] }
  0x88   : > { %2136 = vmatprep.subr.bf16.mxu1 %v2135_v36  ;;  %v250_v4 = vld [vmem:[#allocation4 + $0xb8] sm:$0xff]  ;;  %v251_v5 = vld [vmem:[#allocation4 + $0xc0] sm:$0xff]  ;;  %v252_v6 = vld [vmem:[#allocation4 + $0xc8] sm:$0xff] }
  0x89   : > { %v253_v7 = vld [vmem:[#allocation4 + $0xd0] sm:$0xff]  ;;  %v254_v8 = vld [vmem:[#allocation4 + $0xd8] sm:$0xff]  ;;  %v255_v9 = vld [vmem:[#allocation4 + $0xe0] sm:$0xff] }
  0x8a   : > { %2110 = vmatpush3.bf16.msra.mxu0 %v2107_v15  ;;  %v256_v10 = vld [vmem:[#allocation4 + $0xe8] sm:$0xff]  ;;  %v257_v11 = vld [vmem:[#allocation4 + $0xf0] sm:$0xff]  ;;  %v258_v12 = vld [vmem:[#allocation4 + $0xf8] sm:$0xff] }
  0x8b   : > { %2112 = vmatprep.subr.bf16.mxu0 %v2111_v21  ;;  %2138 = vmatpush3.bf16.msra.mxu1 %v2135_v36  ;;  %v546_v13 = vld [vmem:[#allocation9 + $0x70] sm:$0xff]  ;;  %v547_v14 = vld [vmem:[#allocation9 + $0x78] sm:$0xff] }
  0x8c   : > { %2140 = vmatprep.subr.bf16.mxu1 %v2139_v39  ;;  %v2151_v15 = vpack.c.bf16 %v547_v14, %v546_v13 }
  0x8e   : > { %2114 = vmatpush3.bf16.msra.mxu0 %v2111_v21 }
  0x8f   : > { %2116 = vmatprep.subr.bf16.mxu0 %v2115_v29  ;;  %2142 = vmatpush3.bf16.msra.mxu1 %v2139_v39 }
  0x90   : > { %2144 = vmatprep.subr.bf16.mxu1 %v2143_v44 }
  0x92   : > { %2118 = vmatpush3.bf16.msra.mxu0 %v2115_v29 }
  0x93   : > { %2120 = vmatprep.subr.bf16.mxu0 %v2119_v35  ;;  %2146 = vmatpush3.bf16.msra.mxu1 %v2143_v44 }
  0x94   : > { %2148 = vmatprep.subr.bf16.mxu1 %v2147_v49 }
  0x96   : > { %2122 = vmatpush3.bf16.msra.mxu0 %v2119_v35 }
  0x97   : > { %2150 = vmatpush3.bf16.msra.mxu1 %v2147_v49 }
  0x98   : > { %2152 = vmatprep.subr.bf16.mxu1 %v2151_v15 }
  0x99   : > { %1964 = vmatmul.mubr.f32.vlgmr.msra.gmra.mrb[0].mxu0 %v228_v42 }
  0x9a   : > { %1966 = vmatprep.mubr.f32.mxu0 %v229_v43 }
  0x9b   : > { %2154 = vmatpush3.bf16.msra.mxu1 %v2151_v15 }
  0x9d   : > { %1967 = vmatmul.mubr.f32.gmra.mrb[2].mxu0 %v230_v47 }
  0x9e   : > { %1969 = vmatprep.mubr.f32.mxu0 %v231_v48 }
  0xa1   : > { %1970 = vmatmul.mubr.f32.gmra.mrb[4].mxu0 %v232_v50 }
  0xa2   : > { %1972 = vmatprep.mubr.f32.mxu0 %v233_v51 }
  0xa5   : > { %1973 = vmatmul.mubr.f32.gmra.mrb[6].mxu0 %v234_v52 }
  0xa6   : > { %1975 = vmatprep.mubr.f32.mxu0 %v235_v53 }
  0xa9   : > { %1976 = vmatmul.mubr.f32.gmra.mrb[8].mxu0 %v236_v54 }
  0xaa   : > { %1978 = vmatprep.mubr.f32.mxu0 %v237_v55 }
  0xad   : > { %1979 = vmatmul.mubr.f32.gmra.mrb[10].mxu0 %v238_v56 }
  0xae   : > { %1981 = vmatprep.mubr.f32.mxu0 %v239_v57 }
  0xb1   : > { %1982 = vmatmul.mubr.f32.gmra.mrb[12].mxu0 %v240_v58 }
  0xb2   : > { %1984 = vmatprep.mubr.f32.mxu0 %v241_v59 }
  0xb5   : > { %1985 = vmatmul.mubr.f32.gmra.mrb[14].mxu0 %v242_v60 }
  0xb6   : > { %1987 = vmatprep.mubr.f32.mxu0 %v243_v61 }
  0xb9   : > { %1988 = vmatmul.mubr.f32.gmra.mrb[16].mxu0 %v244_v62 }
  0xba   : > { %1990 = vmatprep.mubr.f32.mxu0 %v245_v63 }
  0xbd   : > { %1991 = vmatmul.mubr.f32.gmra.mrb[18].mxu0 %v246_v0 }
  0xbe   : > { %1993 = vmatprep.mubr.f32.mxu0 %v247_v1 }
  0xc1   : > { %1994 = vmatmul.mubr.f32.gmra.mrb[20].mxu0 %v248_v2 }
  0xc2   : > { %1996 = vmatprep.mubr.f32.mxu0 %v249_v3 }
  0xc5   : > { %1997 = vmatmul.mubr.f32.gmra.mrb[22].mxu0 %v250_v4 }
  0xc6   : > { %1999 = vmatprep.mubr.f32.mxu0 %v251_v5 }
  0xc9   : > { %2000 = vmatmul.mubr.f32.gmra.mrb[24].mxu0 %v252_v6 }
  0xca   : > { %2002 = vmatprep.mubr.f32.mxu0 %v253_v7 }
  0xcd   : > { %2003 = vmatmul.mubr.f32.gmra.mrb[26].mxu0 %v254_v8 }
  0xce   : > { %2005 = vmatprep.mubr.f32.mxu0 %v255_v9 }
  0xd1   : > { %2006 = vmatmul.mubr.f32.gmra.mrb[28].mxu0 %v256_v10 }
  0xd2   : > { %2008 = vmatprep.mubr.f32.mxu0 %v257_v11 }
  0xd5   : > { %2009 = vmatmul.mubr.f32.gmra.mrb[30].mxu0 %v258_v12 }
 0x16c   : > { %v1965_v16 = vpop.f32.mrb[0].mxu0 }
 0x16d   : > { %v341_v17 = vpop.f32.mrb[1].mxu0  ;;  %v501_v19 = vmax.f32 %v1965_v16, 0.0 }
 0x16e   : > { %v500_v18 = vmax.f32 %v341_v17, 0.0 }
 0x170   : > { %v1968_v20 = vpop.f32.mrb[2].mxu0  ;;  %2043 = vmatprep.mubr.f32.mxu1 %v500_v18 }
 0x171   : > { %v351_v21 = vpop.f32.mrb[3].mxu0  ;;  %2044 = vmatmul.mubr.f32.vlgmr.msra.gmra.mrb[0].mxu1 %v501_v19  ;;  %v503_v23 = vmax.f32 %v1968_v20, 0.0 }
 0x172   : > { %v502_v22 = vmax.f32 %v351_v21, 0.0 }
 0x174   : > { %v1971_v24 = vpop.f32.mrb[4].mxu0  ;;  %2046 = vmatprep.mubr.f32.mxu1 %v502_v22 }
 0x175   : > { %v361_v25 = vpop.f32.mrb[5].mxu0  ;;  %2047 = vmatmul.mubr.f32.gmra.mrb[2].mxu1 %v503_v23  ;;  %v505_v27 = vmax.f32 %v1971_v24, 0.0 }
 0x176   : > { %v504_v26 = vmax.f32 %v361_v25, 0.0 }
 0x178   : > { %v1974_v28 = vpop.f32.mrb[6].mxu0  ;;  %2049 = vmatprep.mubr.f32.mxu1 %v504_v26 }
 0x179   : > { %v371_v29 = vpop.f32.mrb[7].mxu0  ;;  %2050 = vmatmul.mubr.f32.gmra.mrb[4].mxu1 %v505_v27  ;;  %v507_v31 = vmax.f32 %v1974_v28, 0.0 }
 0x17a   : > { %v506_v30 = vmax.f32 %v371_v29, 0.0 }
 0x17c   : > { %v1977_v32 = vpop.f32.mrb[8].mxu0  ;;  %2052 = vmatprep.mubr.f32.mxu1 %v506_v30 }
 0x17d   : > { %v381_v33 = vpop.f32.mrb[9].mxu0  ;;  %2053 = vmatmul.mubr.f32.gmra.mrb[6].mxu1 %v507_v31  ;;  %v509_v35 = vmax.f32 %v1977_v32, 0.0 }
 0x17e   : > { %v508_v34 = vmax.f32 %v381_v33, 0.0 }
 0x180   : > { %v1980_v36 = vpop.f32.mrb[10].mxu0  ;;  %2055 = vmatprep.mubr.f32.mxu1 %v508_v34 }
 0x181   : > { %v391_v37 = vpop.f32.mrb[11].mxu0  ;;  %2056 = vmatmul.mubr.f32.gmra.mrb[8].mxu1 %v509_v35  ;;  %v511_v39 = vmax.f32 %v1980_v36, 0.0 }
 0x182   : > { %v510_v38 = vmax.f32 %v391_v37, 0.0 }
 0x184   : > { %v1983_v40 = vpop.f32.mrb[12].mxu0  ;;  %2058 = vmatprep.mubr.f32.mxu1 %v510_v38 }
 0x185   : > { %v401_v41 = vpop.f32.mrb[13].mxu0  ;;  %2059 = vmatmul.mubr.f32.gmra.mrb[10].mxu1 %v511_v39  ;;  %v513_v43 = vmax.f32 %v1983_v40, 0.0 }
 0x186   : > { %v512_v42 = vmax.f32 %v401_v41, 0.0 }
 0x188   : > { %v1986_v44 = vpop.f32.mrb[14].mxu0  ;;  %2061 = vmatprep.mubr.f32.mxu1 %v512_v42 }
 0x189   : > { %v411_v45 = vpop.f32.mrb[15].mxu0  ;;  %2062 = vmatmul.mubr.f32.gmra.mrb[12].mxu1 %v513_v43  ;;  %v515_v47 = vmax.f32 %v1986_v44, 0.0 }
 0x18a   : > { %v514_v46 = vmax.f32 %v411_v45, 0.0 }
 0x18c   : > { %v1989_v48 = vpop.f32.mrb[16].mxu0  ;;  %2064 = vmatprep.mubr.f32.mxu1 %v514_v46 }
 0x18d   : > { %v421_v49 = vpop.f32.mrb[17].mxu0  ;;  %2065 = vmatmul.mubr.f32.gmra.mrb[14].mxu1 %v515_v47  ;;  %v517_v51 = vmax.f32 %v1989_v48, 0.0 }
 0x18e   : > { %v516_v50 = vmax.f32 %v421_v49, 0.0 }
 0x190   : > { %v1992_v52 = vpop.f32.mrb[18].mxu0  ;;  %2067 = vmatprep.mubr.f32.mxu1 %v516_v50 }
 0x191   : > { %v431_v53 = vpop.f32.mrb[19].mxu0  ;;  %2068 = vmatmul.mubr.f32.gmra.mrb[16].mxu1 %v517_v51  ;;  %v519_v55 = vmax.f32 %v1992_v52, 0.0 }
 0x192   : > { %v518_v54 = vmax.f32 %v431_v53, 0.0 }
 0x194   : > { %v1995_v56 = vpop.f32.mrb[20].mxu0  ;;  %2070 = vmatprep.mubr.f32.mxu1 %v518_v54 }
 0x195   : > { %v441_v57 = vpop.f32.mrb[21].mxu0  ;;  %2071 = vmatmul.mubr.f32.gmra.mrb[18].mxu1 %v519_v55  ;;  %v521_v59 = vmax.f32 %v1995_v56, 0.0 }
 0x196   : > { %v520_v58 = vmax.f32 %v441_v57, 0.0 }
 0x198   : > { %v1998_v60 = vpop.f32.mrb[22].mxu0  ;;  %2073 = vmatprep.mubr.f32.mxu1 %v520_v58 }
 0x199   : > { %v451_v61 = vpop.f32.mrb[23].mxu0  ;;  %2074 = vmatmul.mubr.f32.gmra.mrb[20].mxu1 %v521_v59  ;;  %v523_v63 = vmax.f32 %v1998_v60, 0.0 }
 0x19a   : > { %v522_v62 = vmax.f32 %v451_v61, 0.0 }
 0x19c   : > { %v2001_v0 = vpop.f32.mrb[24].mxu0  ;;  %2076 = vmatprep.mubr.f32.mxu1 %v522_v62 }
 0x19d   : > { %v461_v1 = vpop.f32.mrb[25].mxu0  ;;  %2077 = vmatmul.mubr.f32.gmra.mrb[22].mxu1 %v523_v63  ;;  %v525_v3 = vmax.f32 %v2001_v0, 0.0 }
 0x19e   : > { %v524_v2 = vmax.f32 %v461_v1, 0.0 }
 0x1a0   : > { %v2004_v4 = vpop.f32.mrb[26].mxu0  ;;  %2079 = vmatprep.mubr.f32.mxu1 %v524_v2 }
 0x1a1   : > { %v471_v5 = vpop.f32.mrb[27].mxu0  ;;  %2080 = vmatmul.mubr.f32.gmra.mrb[24].mxu1 %v525_v3  ;;  %v527_v7 = vmax.f32 %v2004_v4, 0.0 }
 0x1a2   : > { %v526_v6 = vmax.f32 %v471_v5, 0.0 }
 0x1a4   : > { %v2007_v8 = vpop.f32.mrb[28].mxu0  ;;  %2082 = vmatprep.mubr.f32.mxu1 %v526_v6 }
 0x1a5   : > { %v481_v9 = vpop.f32.mrb[29].mxu0  ;;  %2083 = vmatmul.mubr.f32.gmra.mrb[26].mxu1 %v527_v7  ;;  %v529_v11 = vmax.f32 %v2007_v8, 0.0 }
 0x1a6   : > { %v528_v10 = vmax.f32 %v481_v9, 0.0 }
 0x1a8   : > { %v2010_v12 = vpop.f32.mrb[30].mxu0  ;;  %2085 = vmatprep.mubr.f32.mxu1 %v528_v10 }
 0x1a9   : > { %v491_v13 = vpop.f32.mrb[31].mxu0  ;;  %2086 = vmatmul.mubr.f32.gmra.mrb[28].mxu1 %v529_v11  ;;  %v531_v15 = vmax.f32 %v2010_v12, 0.0 }
 0x1aa   : > { %v530_v14 = vmax.f32 %v491_v13, 0.0 }
 0x1ac   : > { %2088 = vmatprep.mubr.f32.mxu1 %v530_v14 }
 0x1ad   : > { %2089 = vmatmul.mubr.f32.gmra.mrb[30].mxu1 %v531_v15 }
 0x244   : > { %v2045_v16 = vpop.f32.mrb[0].mxu1 }
 0x245   : > { %774 = vst [vmem:[#allocation2 + $0x8] sm:$0xff] %v2045_v16  ;;  %806 = vst [vmem:[#allocation3 + $0x8] sm:$0xff] %v2045_v16  ;;  %v614_v17 = vpop.f32.mrb[1].mxu1 }
 0x246   : > { %773 = vst [vmem:[#allocation2] sm:$0xff] %v614_v17  ;;  %805 = vst [vmem:[#allocation3] sm:$0xff] %v614_v17 }
 0x248   : > { %v2048_v18 = vpop.f32.mrb[2].mxu1 }
 0x249   : > { %776 = vst [vmem:[#allocation2 + $0x18] sm:$0xff] %v2048_v18  ;;  %808 = vst [vmem:[#allocation3 + $0x18] sm:$0xff] %v2048_v18  ;;  %v624_v19 = vpop.f32.mrb[3].mxu1 }
 0x24a   : > { %775 = vst [vmem:[#allocation2 + $0x10] sm:$0xff] %v624_v19  ;;  %807 = vst [vmem:[#allocation3 + $0x10] sm:$0xff] %v624_v19 }
 0x24c   : > { %v2051_v20 = vpop.f32.mrb[4].mxu1 }
 0x24d   : > { %778 = vst [vmem:[#allocation2 + $0x28] sm:$0xff] %v2051_v20  ;;  %810 = vst [vmem:[#allocation3 + $0x28] sm:$0xff] %v2051_v20  ;;  %v634_v21 = vpop.f32.mrb[5].mxu1 }
 0x24e   : > { %777 = vst [vmem:[#allocation2 + $0x20] sm:$0xff] %v634_v21  ;;  %809 = vst [vmem:[#allocation3 + $0x20] sm:$0xff] %v634_v21 }
 0x250   : > { %v2054_v22 = vpop.f32.mrb[6].mxu1 }
 0x251   : > { %780 = vst [vmem:[#allocation2 + $0x38] sm:$0xff] %v2054_v22  ;;  %812 = vst [vmem:[#allocation3 + $0x38] sm:$0xff] %v2054_v22  ;;  %v644_v23 = vpop.f32.mrb[7].mxu1 }
 0x252   : > { %779 = vst [vmem:[#allocation2 + $0x30] sm:$0xff] %v644_v23  ;;  %811 = vst [vmem:[#allocation3 + $0x30] sm:$0xff] %v644_v23 }
 0x254   : > { %v2057_v24 = vpop.f32.mrb[8].mxu1 }
 0x255   : > { %782 = vst [vmem:[#allocation2 + $0x48] sm:$0xff] %v2057_v24  ;;  %814 = vst [vmem:[#allocation3 + $0x48] sm:$0xff] %v2057_v24  ;;  %v654_v25 = vpop.f32.mrb[9].mxu1 }
 0x256   : > { %781 = vst [vmem:[#allocation2 + $0x40] sm:$0xff] %v654_v25  ;;  %813 = vst [vmem:[#allocation3 + $0x40] sm:$0xff] %v654_v25 }
 0x258   : > { %v2060_v26 = vpop.f32.mrb[10].mxu1 }
 0x259   : > { %784 = vst [vmem:[#allocation2 + $0x58] sm:$0xff] %v2060_v26  ;;  %816 = vst [vmem:[#allocation3 + $0x58] sm:$0xff] %v2060_v26  ;;  %v664_v27 = vpop.f32.mrb[11].mxu1 }
 0x25a   : > { %783 = vst [vmem:[#allocation2 + $0x50] sm:$0xff] %v664_v27  ;;  %815 = vst [vmem:[#allocation3 + $0x50] sm:$0xff] %v664_v27 }
 0x25c   : > { %v2063_v28 = vpop.f32.mrb[12].mxu1 }
 0x25d   : > { %786 = vst [vmem:[#allocation2 + $0x68] sm:$0xff] %v2063_v28  ;;  %818 = vst [vmem:[#allocation3 + $0x68] sm:$0xff] %v2063_v28  ;;  %v674_v29 = vpop.f32.mrb[13].mxu1 }
 0x25e   : > { %785 = vst [vmem:[#allocation2 + $0x60] sm:$0xff] %v674_v29  ;;  %817 = vst [vmem:[#allocation3 + $0x60] sm:$0xff] %v674_v29 }
 0x260   : > { %v2066_v30 = vpop.f32.mrb[14].mxu1 }
 0x261   : > { %788 = vst [vmem:[#allocation2 + $0x78] sm:$0xff] %v2066_v30  ;;  %820 = vst [vmem:[#allocation3 + $0x78] sm:$0xff] %v2066_v30  ;;  %v684_v31 = vpop.f32.mrb[15].mxu1 }
 0x262   : > { %787 = vst [vmem:[#allocation2 + $0x70] sm:$0xff] %v684_v31  ;;  %819 = vst [vmem:[#allocation3 + $0x70] sm:$0xff] %v684_v31 }
 0x264   : > { %v2069_v32 = vpop.f32.mrb[16].mxu1 }
 0x265   : > { %790 = vst [vmem:[#allocation2 + $0x88] sm:$0xff] %v2069_v32  ;;  %822 = vst [vmem:[#allocation3 + $0x88] sm:$0xff] %v2069_v32  ;;  %v694_v33 = vpop.f32.mrb[17].mxu1 }
 0x266   : > { %789 = vst [vmem:[#allocation2 + $0x80] sm:$0xff] %v694_v33  ;;  %821 = vst [vmem:[#allocation3 + $0x80] sm:$0xff] %v694_v33 }
 0x268   : > { %v2072_v34 = vpop.f32.mrb[18].mxu1 }
 0x269   : > { %792 = vst [vmem:[#allocation2 + $0x98] sm:$0xff] %v2072_v34  ;;  %824 = vst [vmem:[#allocation3 + $0x98] sm:$0xff] %v2072_v34  ;;  %v704_v35 = vpop.f32.mrb[19].mxu1 }
 0x26a   : > { %791 = vst [vmem:[#allocation2 + $0x90] sm:$0xff] %v704_v35  ;;  %823 = vst [vmem:[#allocation3 + $0x90] sm:$0xff] %v704_v35 }
 0x26c   : > { %v2075_v36 = vpop.f32.mrb[20].mxu1 }
 0x26d   : > { %794 = vst [vmem:[#allocation2 + $0xa8] sm:$0xff] %v2075_v36  ;;  %826 = vst [vmem:[#allocation3 + $0xa8] sm:$0xff] %v2075_v36  ;;  %v714_v37 = vpop.f32.mrb[21].mxu1 }
 0x26e   : > { %793 = vst [vmem:[#allocation2 + $0xa0] sm:$0xff] %v714_v37  ;;  %825 = vst [vmem:[#allocation3 + $0xa0] sm:$0xff] %v714_v37 }
 0x270   : > { %v2078_v38 = vpop.f32.mrb[22].mxu1 }
 0x271   : > { %796 = vst [vmem:[#allocation2 + $0xb8] sm:$0xff] %v2078_v38  ;;  %828 = vst [vmem:[#allocation3 + $0xb8] sm:$0xff] %v2078_v38  ;;  %v724_v39 = vpop.f32.mrb[23].mxu1 }
 0x272   : > { %795 = vst [vmem:[#allocation2 + $0xb0] sm:$0xff] %v724_v39  ;;  %827 = vst [vmem:[#allocation3 + $0xb0] sm:$0xff] %v724_v39 }
 0x274   : > { %v2081_v40 = vpop.f32.mrb[24].mxu1 }
 0x275   : > { %798 = vst [vmem:[#allocation2 + $0xc8] sm:$0xff] %v2081_v40  ;;  %830 = vst [vmem:[#allocation3 + $0xc8] sm:$0xff] %v2081_v40  ;;  %v734_v41 = vpop.f32.mrb[25].mxu1 }
 0x276   : > { %797 = vst [vmem:[#allocation2 + $0xc0] sm:$0xff] %v734_v41  ;;  %829 = vst [vmem:[#allocation3 + $0xc0] sm:$0xff] %v734_v41 }
 0x278   : > { %v2084_v42 = vpop.f32.mrb[26].mxu1 }
 0x279   : > { %800 = vst [vmem:[#allocation2 + $0xd8] sm:$0xff] %v2084_v42  ;;  %832 = vst [vmem:[#allocation3 + $0xd8] sm:$0xff] %v2084_v42  ;;  %v744_v43 = vpop.f32.mrb[27].mxu1 }
 0x27a   : > { %799 = vst [vmem:[#allocation2 + $0xd0] sm:$0xff] %v744_v43  ;;  %831 = vst [vmem:[#allocation3 + $0xd0] sm:$0xff] %v744_v43 }
 0x27c   : > { %v2087_v44 = vpop.f32.mrb[28].mxu1 }
 0x27d   : > { %802 = vst [vmem:[#allocation2 + $0xe8] sm:$0xff] %v2087_v44  ;;  %834 = vst [vmem:[#allocation3 + $0xe8] sm:$0xff] %v2087_v44  ;;  %v754_v45 = vpop.f32.mrb[29].mxu1 }
 0x27e   : > { %801 = vst [vmem:[#allocation2 + $0xe0] sm:$0xff] %v754_v45  ;;  %833 = vst [vmem:[#allocation3 + $0xe0] sm:$0xff] %v754_v45 }
 0x280   : > { %v2090_v46 = vpop.f32.mrb[30].mxu1 }
 0x281   : > { %804 = vst [vmem:[#allocation2 + $0xf8] sm:$0xff] %v2090_v46  ;;  %836 = vst [vmem:[#allocation3 + $0xf8] sm:$0xff] %v2090_v46  ;;  %v764_v47 = vpop.f32.mrb[31].mxu1 }
 0x282   : > { %803 = vst [vmem:[#allocation2 + $0xf0] sm:$0xff] %v764_v47  ;;  %835 = vst [vmem:[#allocation3 + $0xf0] sm:$0xff] %v764_v47 }
 0x283 PF: > { %v901_v48 = vld [vmem:[#allocation3] sm:$0xff]  ;;  %v902_v49 = vld [vmem:[#allocation3 + $0x8] sm:$0xff]  ;;  %v903_v50 = vld [vmem:[#allocation3 + $0x10] sm:$0xff]  ;;  %v2596_v51 = vmov 0.0|0.0   ;;  %p1830_p7 = scmp.ne.s32.totalorder %s2631_s16, 2 }
 0x284   : > { %2155 = vmatprep.subr.bf16.mxu0 %v2596_v51  ;;  %2203 = vmatprep.subr.bf16.mxu1 %v2596_v51  ;;  %v2156_v52 = vpack.c.bf16 %v902_v49, %v901_v48  ;;  %v904_v53 = vld [vmem:[#allocation3 + $0x18] sm:$0xff]  ;;  %v905_v55 = vld [vmem:[#allocation3 + $0x20] sm:$0xff]  ;;  %v906_v56 = vld [vmem:[#allocation3 + $0x28] sm:$0xff] }
 0x285   : > { %v2159_v54 = vpack.c.bf16 %v904_v53, %v903_v50  ;;  %v2162_v57 = vpack.c.bf16 %v906_v56, %v905_v55  ;;  %v907_v58 = vld [vmem:[#allocation3 + $0x30] sm:$0xff]  ;;  %v908_v59 = vld [vmem:[#allocation3 + $0x38] sm:$0xff]  ;;  %v838_v60 = vld [vmem:[#allocation10 + $0x8] sm:$0xff] }
 0x286   : > { %2157 = vmatpush1.bf16.msra.mxu0 %v2156_v52  ;;  %2219 = vmatpush1.bf16.msra.mxu1 %v2156_v52  ;;  %v2165_v61 = vpack.c.bf16 %v908_v59, %v907_v58  ;;  %v870_v62 = vld [vmem:[#allocation10 + $0x108] sm:$0xff]  ;;  %v909_v63 = vld [vmem:[#allocation3 + $0x40] sm:$0xff]  ;;  %v911_v2 = vld [vmem:[#allocation3 + $0x50] sm:$0xff] }
 0x287   : > { %2158 = vmatprep.subr.bf16.mxu0 %v2596_v51  ;;  %2204 = vmatprep.subr.bf16.mxu1 %v2596_v51  ;;  %v910_v0 = vld [vmem:[#allocation3 + $0x48] sm:$0xff]  ;;  %v912_v3 = vld [vmem:[#allocation3 + $0x58] sm:$0xff]  ;;  %v913_v5 = vld [vmem:[#allocation3 + $0x60] sm:$0xff] }
 0x288   : > { %997 = vmatprep.mubr.f32.mxu0 %v838_v60  ;;  %1077 = vmatprep.mubr.f32.mxu1 %v870_v62  ;;  %v2168_v1 = vpack.c.bf16 %v910_v0, %v909_v63  ;;  %v2171_v4 = vpack.c.bf16 %v912_v3, %v911_v2  ;;  %v914_v6 = vld [vmem:[#allocation3 + $0x68] sm:$0xff]  ;;  %v915_v8 = vld [vmem:[#allocation3 + $0x70] sm:$0xff]  ;;  %v916_v9 = vld [vmem:[#allocation3 + $0x78] sm:$0xff] }
 0x289   : > { %v2174_v7 = vpack.c.bf16 %v914_v6, %v913_v5  ;;  %v2177_v10 = vpack.c.bf16 %v916_v9, %v915_v8  ;;  %v917_v11 = vld [vmem:[#allocation3 + $0x80] sm:$0xff]  ;;  %v918_v12 = vld [vmem:[#allocation3 + $0x88] sm:$0xff]  ;;  %v919_v14 = vld [vmem:[#allocation3 + $0x90] sm:$0xff] }
 0x28a   : > { %2160 = vmatpush1.bf16.msra.mxu0 %v2159_v54  ;;  %2220 = vmatpush1.bf16.msra.mxu1 %v2159_v54  ;;  %v2180_v13 = vpack.c.bf16 %v918_v12, %v917_v11  ;;  %v920_v15 = vld [vmem:[#allocation3 + $0x98] sm:$0xff]  ;;  %v921_v17 = vld [vmem:[#allocation3 + $0xa0] sm:$0xff]  ;;  %v922_v18 = vld [vmem:[#allocation3 + $0xa8] sm:$0xff] }
 0x28b   : > { %2161 = vmatprep.subr.bf16.mxu0 %v2596_v51  ;;  %2205 = vmatprep.subr.bf16.mxu1 %v2596_v51  ;;  %v2183_v16 = vpack.c.bf16 %v920_v15, %v919_v14  ;;  %v2186_v19 = vpack.c.bf16 %v922_v18, %v921_v17  ;;  %v923_v20 = vld [vmem:[#allocation3 + $0xb0] sm:$0xff]  ;;  %v924_v21 = vld [vmem:[#allocation3 + $0xb8] sm:$0xff]  ;;  %v925_v23 = vld [vmem:[#allocation3 + $0xc0] sm:$0xff] }
 0x28c   : > { %v2189_v22 = vpack.c.bf16 %v924_v21, %v923_v20  ;;  %v926_v24 = vld [vmem:[#allocation3 + $0xc8] sm:$0xff]  ;;  %v927_v26 = vld [vmem:[#allocation3 + $0xd0] sm:$0xff]  ;;  %v928_v27 = vld [vmem:[#allocation3 + $0xd8] sm:$0xff] }
 0x28d   : > { %v2192_v25 = vpack.c.bf16 %v926_v24, %v925_v23  ;;  %v2195_v28 = vpack.c.bf16 %v928_v27, %v927_v26  ;;  %v929_v29 = vld [vmem:[#allocation3 + $0xe0] sm:$0xff]  ;;  %v930_v30 = vld [vmem:[#allocation3 + $0xe8] sm:$0xff]  ;;  %v931_v32 = vld [vmem:[#allocation3 + $0xf0] sm:$0xff] }
 0x28e   : > { %2163 = vmatpush1.bf16.msra.mxu0 %v2162_v57  ;;  %2221 = vmatpush1.bf16.msra.mxu1 %v2162_v57  ;;  %v2198_v31 = vpack.c.bf16 %v930_v30, %v929_v29  ;;  %v932_v33 = vld [vmem:[#allocation3 + $0xf8] sm:$0xff]  ;;  %v837_v35 = vld [vmem:[#allocation10] sm:$0xff]  ;;  %v839_v39 = vld [vmem:[#allocation10 + $0x10] sm:$0xff] }
 0x28f   : > { %2164 = vmatprep.subr.bf16.mxu0 %v2596_v51  ;;  %2206 = vmatprep.subr.bf16.mxu1 %v2596_v51  ;;  %v2201_v34 = vpack.c.bf16 %v932_v33, %v931_v32  ;;  %v869_v36 = vld [vmem:[#allocation10 + $0x100] sm:$0xff]  ;;  %v840_v37 = vld [vmem:[#allocation10 + $0x18] sm:$0xff]  ;;  %v871_v40 = vld [vmem:[#allocation10 + $0x110] sm:$0xff] }
 0x290   : > { %v872_v38 = vld [vmem:[#allocation10 + $0x118] sm:$0xff]  ;;  %v842_v41 = vld [vmem:[#allocation10 + $0x28] sm:$0xff]  ;;  %v841_v43 = vld [vmem:[#allocation10 + $0x20] sm:$0xff] }
 0x291   : > { %v874_v42 = vld [vmem:[#allocation10 + $0x128] sm:$0xff]  ;;  %v873_v44 = vld [vmem:[#allocation10 + $0x120] sm:$0xff]  ;;  %v844_v45 = vld [vmem:[#allocation10 + $0x38] sm:$0xff] }
 0x292   : > { %2166 = vmatpush1.bf16.msra.mxu0 %v2165_v61  ;;  %2222 = vmatpush1.bf16.msra.mxu1 %v2165_v61  ;;  %v876_v46 = vld [vmem:[#allocation10 + $0x138] sm:$0xff]  ;;  %v843_v47 = vld [vmem:[#allocation10 + $0x30] sm:$0xff]  ;;  %v846_v49 = vld [vmem:[#allocation10 + $0x48] sm:$0xff] }
 0x293   : > { %2167 = vmatprep.subr.bf16.mxu0 %v2596_v51  ;;  %2207 = vmatprep.subr.bf16.mxu1 %v2596_v51  ;;  %v875_v48 = vld [vmem:[#allocation10 + $0x130] sm:$0xff]  ;;  %v878_v50 = vld [vmem:[#allocation10 + $0x148] sm:$0xff]  ;;  %v877_v52 = vld [vmem:[#allocation10 + $0x140] sm:$0xff] }
 0x294   : > { %v848_v53 = vld [vmem:[#allocation10 + $0x58] sm:$0xff]  ;;  %v847_v55 = vld [vmem:[#allocation10 + $0x50] sm:$0xff]  ;;  %v850_v57 = vld [vmem:[#allocation10 + $0x68] sm:$0xff] }
 0x295   : > { %v880_v54 = vld [vmem:[#allocation10 + $0x158] sm:$0xff]  ;;  %v879_v56 = vld [vmem:[#allocation10 + $0x150] sm:$0xff]  ;;  %v882_v58 = vld [vmem:[#allocation10 + $0x168] sm:$0xff] }
 0x296   : > { %2169 = vmatpush1.bf16.msra.mxu0 %v2168_v1  ;;  %2223 = vmatpush1.bf16.msra.mxu1 %v2168_v1  ;;  %v849_v59 = vld [vmem:[#allocation10 + $0x60] sm:$0xff]  ;;  %v852_v61 = vld [vmem:[#allocation10 + $0x78] sm:$0xff]  ;;  %v851_v63 = vld [vmem:[#allocation10 + $0x70] sm:$0xff] }
 0x297   : > { %2170 = vmatprep.subr.bf16.mxu0 %v2596_v51  ;;  %2208 = vmatprep.subr.bf16.mxu1 %v2596_v51  ;;  %v881_v60 = vld [vmem:[#allocation10 + $0x160] sm:$0xff]  ;;  %v884_v62 = vld [vmem:[#allocation10 + $0x178] sm:$0xff]  ;;  %v883_v0 = vld [vmem:[#allocation10 + $0x170] sm:$0xff] }
 0x298   : > { %v854_v1 = vld [vmem:[#allocation10 + $0x88] sm:$0xff]  ;;  %v853_v3 = vld [vmem:[#allocation10 + $0x80] sm:$0xff]  ;;  %v856_v5 = vld [vmem:[#allocation10 + $0x98] sm:$0xff] }
 0x299   : > { %v886_v2 = vld [vmem:[#allocation10 + $0x188] sm:$0xff]  ;;  %v888_v6 = vld [vmem:[#allocation10 + $0x198] sm:$0xff]  ;;  %v887_v8 = vld [vmem:[#allocation10 + $0x190] sm:$0xff] }
 0x29a   : > { %2172 = vmatpush1.bf16.msra.mxu0 %v2171_v4  ;;  %2224 = vmatpush1.bf16.msra.mxu1 %v2171_v4  ;;  %v885_v4 = vld [vmem:[#allocation10 + $0x180] sm:$0xff]  ;;  %v858_v9 = vld [vmem:[#allocation10 + $0xa8] sm:$0xff]  ;;  %v892_v14 = vld [vmem:[#allocation10 + $0x1b8] sm:$0xff] }
 0x29b   : > { %2173 = vmatprep.subr.bf16.mxu0 %v2596_v51  ;;  %2209 = vmatprep.subr.bf16.mxu1 %v2596_v51  ;;  %v857_v11 = vld [vmem:[#allocation10 + $0xa0] sm:$0xff]  ;;  %v859_v15 = vld [vmem:[#allocation10 + $0xb0] sm:$0xff]  ;;  %v862_v17 = vld [vmem:[#allocation10 + $0xc8] sm:$0xff] }
 0x29c   : > { %v889_v12 = vld [vmem:[#allocation10 + $0x1a0] sm:$0xff]  ;;  %v894_v18 = vld [vmem:[#allocation10 + $0x1c8] sm:$0xff]  ;;  %v864_v21 = vld [vmem:[#allocation10 + $0xd8] sm:$0xff] }
 0x29d   : > { %v893_v20 = vld [vmem:[#allocation10 + $0x1c0] sm:$0xff]  ;;  %v863_v23 = vld [vmem:[#allocation10 + $0xd0] sm:$0xff]  ;;  %v898_v26 = vld [vmem:[#allocation10 + $0x1e8] sm:$0xff] }
 0x29e   : > { %2175 = vmatpush1.bf16.msra.mxu0 %v2174_v7  ;;  %2225 = vmatpush1.bf16.msra.mxu1 %v2174_v7  ;;  %v855_v7 = vld [vmem:[#allocation10 + $0x90] sm:$0xff]  ;;  %v865_v27 = vld [vmem:[#allocation10 + $0xe0] sm:$0xff]  ;;  %v868_v29 = vld [vmem:[#allocation10 + $0xf8] sm:$0xff] }
 0x29f   : > { %2176 = vmatprep.subr.bf16.mxu0 %v2596_v51  ;;  %2210 = vmatprep.subr.bf16.mxu1 %v2596_v51  ;;  %v895_v24 = vld [vmem:[#allocation10 + $0x1d0] sm:$0xff]  ;;  %v900_v30 = vld [vmem:[#allocation10 + $0x1f8] sm:$0xff]  ;;  %v1190_v33 = vld [vmem:[#allocation2] sm:$0xff] }
 0x2a0   : > { %v899_v32 = vld [vmem:[#allocation10 + $0x1f0] sm:$0xff] }
 0x2a2   : > { %2178 = vmatpush1.bf16.msra.mxu0 %v2177_v10  ;;  %2226 = vmatpush1.bf16.msra.mxu1 %v2177_v10  ;;  %v890_v10 = vld [vmem:[#allocation10 + $0x1a8] sm:$0xff] }
 0x2a3   : > { %2179 = vmatprep.subr.bf16.mxu0 %v2596_v51  ;;  %2211 = vmatprep.subr.bf16.mxu1 %v2596_v51 }
 0x2a6   : > { %2181 = vmatpush1.bf16.msra.mxu0 %v2180_v13  ;;  %2227 = vmatpush1.bf16.msra.mxu1 %v2180_v13  ;;  %v860_v13 = vld [vmem:[#allocation10 + $0xb8] sm:$0xff] }
 0x2a7   : > { %2182 = vmatprep.subr.bf16.mxu0 %v2596_v51  ;;  %2212 = vmatprep.subr.bf16.mxu1 %v2596_v51 }
 0x2aa   : > { %2184 = vmatpush1.bf16.msra.mxu0 %v2183_v16  ;;  %2228 = vmatpush1.bf16.msra.mxu1 %v2183_v16  ;;  %v891_v16 = vld [vmem:[#allocation10 + $0x1b0] sm:$0xff] }
 0x2ab   : > { %2185 = vmatprep.subr.bf16.mxu0 %v2596_v51  ;;  %2213 = vmatprep.subr.bf16.mxu1 %v2596_v51 }
 0x2ae   : > { %2187 = vmatpush1.bf16.msra.mxu0 %v2186_v19  ;;  %2229 = vmatpush1.bf16.msra.mxu1 %v2186_v19  ;;  %v861_v19 = vld [vmem:[#allocation10 + $0xc0] sm:$0xff] }
 0x2af   : > { %2188 = vmatprep.subr.bf16.mxu0 %v2596_v51  ;;  %2214 = vmatprep.subr.bf16.mxu1 %v2596_v51 }
 0x2b2   : > { %2190 = vmatpush1.bf16.msra.mxu0 %v2189_v22  ;;  %2230 = vmatpush1.bf16.msra.mxu1 %v2189_v22  ;;  %v896_v22 = vld [vmem:[#allocation10 + $0x1d8] sm:$0xff] }
 0x2b3   : > { %2191 = vmatprep.subr.bf16.mxu0 %v2596_v51  ;;  %2215 = vmatprep.subr.bf16.mxu1 %v2596_v51 }
 0x2b6   : > { %2193 = vmatpush1.bf16.msra.mxu0 %v2192_v25  ;;  %2231 = vmatpush1.bf16.msra.mxu1 %v2192_v25  ;;  %v866_v25 = vld [vmem:[#allocation10 + $0xe8] sm:$0xff] }
 0x2b7   : > { %2194 = vmatprep.subr.bf16.mxu0 %v2596_v51  ;;  %2216 = vmatprep.subr.bf16.mxu1 %v2596_v51 }
 0x2ba   : > { %2196 = vmatpush1.bf16.msra.mxu0 %v2195_v28  ;;  %2232 = vmatpush1.bf16.msra.mxu1 %v2195_v28  ;;  %v897_v28 = vld [vmem:[#allocation10 + $0x1e0] sm:$0xff] }
 0x2bb   : > { %2197 = vmatprep.subr.bf16.mxu0 %v2596_v51  ;;  %2217 = vmatprep.subr.bf16.mxu1 %v2596_v51 }
 0x2be   : > { %2199 = vmatpush1.bf16.msra.mxu0 %v2198_v31  ;;  %2233 = vmatpush1.bf16.msra.mxu1 %v2198_v31  ;;  %v867_v31 = vld [vmem:[#allocation10 + $0xf0] sm:$0xff] }
 0x2bf   : > { %2200 = vmatprep.subr.bf16.mxu0 %v2596_v51  ;;  %2218 = vmatprep.subr.bf16.mxu1 %v2596_v51  ;;  %v845_v51 = vld [vmem:[#allocation10 + $0x40] sm:$0xff] }
 0x2c2   : > { %2202 = vmatpush1.bf16.msra.mxu0 %v2201_v34  ;;  %2234 = vmatpush1.bf16.msra.mxu1 %v2201_v34  ;;  %v1206_v34 = vld [vmem:[#allocation2 + $0x80] sm:$0xff] }
 0x2c5   : > { %998 = vmatmul.mubr.f32.vlgmr.msra.gmra.mrb[0].mxu0 %v837_v35  ;;  %1078 = vmatmul.mubr.f32.vlgmr.msra.gmra.mrb[0].mxu1 %v869_v36  ;;  %v1222_v35 = vmul.f32 0.1, %v1190_v33  ;;  %v1238_v36 = vmul.f32 0.1, %v1206_v34 }
 0x2c6   : > { %1002 = vmatprep.mubr.f32.mxu0 %v840_v37  ;;  %1082 = vmatprep.mubr.f32.mxu1 %v872_v38 }
 0x2c9   : > { %1003 = vmatmul.mubr.f32.gmra.mrb[2].mxu0 %v839_v39  ;;  %1083 = vmatmul.mubr.f32.gmra.mrb[2].mxu1 %v871_v40  ;;  %v1191_v39 = vld [vmem:[#allocation2 + $0x8] sm:$0xff] }
 0x2ca   : > { %1007 = vmatprep.mubr.f32.mxu0 %v842_v41  ;;  %1087 = vmatprep.mubr.f32.mxu1 %v874_v42  ;;  %v1207_v40 = vld [vmem:[#allocation2 + $0x88] sm:$0xff] }
 0x2cd   : > { %1008 = vmatmul.mubr.f32.gmra.mrb[4].mxu0 %v841_v43  ;;  %1088 = vmatmul.mubr.f32.gmra.mrb[4].mxu1 %v873_v44 }
 0x2ce   : > { %1012 = vmatprep.mubr.f32.mxu0 %v844_v45  ;;  %1092 = vmatprep.mubr.f32.mxu1 %v876_v46 }
 0x2d1   : > { %1013 = vmatmul.mubr.f32.gmra.mrb[6].mxu0 %v843_v47  ;;  %1093 = vmatmul.mubr.f32.gmra.mrb[6].mxu1 %v875_v48  ;;  %v1223_v47 = vmul.f32 0.1, %v1191_v39  ;;  %v1239_v48 = vmul.f32 0.1, %v1207_v40 }
 0x2d2   : > { %1017 = vmatprep.mubr.f32.mxu0 %v846_v49  ;;  %1097 = vmatprep.mubr.f32.mxu1 %v878_v50 }
 0x2d5   : > { %1018 = vmatmul.mubr.f32.gmra.mrb[8].mxu0 %v845_v51  ;;  %1098 = vmatmul.mubr.f32.gmra.mrb[8].mxu1 %v877_v52  ;;  %v1192_v51 = vld [vmem:[#allocation2 + $0x10] sm:$0xff] }
 0x2d6   : > { %1022 = vmatprep.mubr.f32.mxu0 %v848_v53  ;;  %1102 = vmatprep.mubr.f32.mxu1 %v880_v54  ;;  %v1208_v52 = vld [vmem:[#allocation2 + $0x90] sm:$0xff] }
 0x2d9   : > { %1023 = vmatmul.mubr.f32.gmra.mrb[10].mxu0 %v847_v55  ;;  %1103 = vmatmul.mubr.f32.gmra.mrb[10].mxu1 %v879_v56 }
 0x2da   : > { %1027 = vmatprep.mubr.f32.mxu0 %v850_v57  ;;  %1107 = vmatprep.mubr.f32.mxu1 %v882_v58 }
 0x2dd   : > { %1028 = vmatmul.mubr.f32.gmra.mrb[12].mxu0 %v849_v59  ;;  %1108 = vmatmul.mubr.f32.gmra.mrb[12].mxu1 %v881_v60  ;;  %v1224_v59 = vmul.f32 0.1, %v1192_v51  ;;  %v1240_v60 = vmul.f32 0.1, %v1208_v52 }
 0x2de   : > { %1032 = vmatprep.mubr.f32.mxu0 %v852_v61  ;;  %1112 = vmatprep.mubr.f32.mxu1 %v884_v62 }
 0x2e1   : > { %1033 = vmatmul.mubr.f32.gmra.mrb[14].mxu0 %v851_v63  ;;  %1113 = vmatmul.mubr.f32.gmra.mrb[14].mxu1 %v883_v0  ;;  %v1193_v63 = vld [vmem:[#allocation2 + $0x18] sm:$0xff] }
 0x2e2   : > { %1037 = vmatprep.mubr.f32.mxu0 %v854_v1  ;;  %1117 = vmatprep.mubr.f32.mxu1 %v886_v2  ;;  %v1209_v0 = vld [vmem:[#allocation2 + $0x98] sm:$0xff] }
 0x2e5   : > { %1038 = vmatmul.mubr.f32.gmra.mrb[16].mxu0 %v853_v3  ;;  %1118 = vmatmul.mubr.f32.gmra.mrb[16].mxu1 %v885_v4 }
 0x2e6   : > { %1042 = vmatprep.mubr.f32.mxu0 %v856_v5  ;;  %1122 = vmatprep.mubr.f32.mxu1 %v888_v6 }
 0x2e9   : > { %1043 = vmatmul.mubr.f32.gmra.mrb[18].mxu0 %v855_v7  ;;  %1123 = vmatmul.mubr.f32.gmra.mrb[18].mxu1 %v887_v8  ;;  %v1225_v7 = vmul.f32 0.1, %v1193_v63  ;;  %v1241_v8 = vmul.f32 0.1, %v1209_v0  ;;  %v1198_v63 = vld [vmem:[#allocation2 + $0x40] sm:$0xff] }
 0x2ea   : > { %1047 = vmatprep.mubr.f32.mxu0 %v858_v9  ;;  %1127 = vmatprep.mubr.f32.mxu1 %v890_v10  ;;  %v1214_v0 = vld [vmem:[#allocation2 + $0xc0] sm:$0xff] }
 0x2ed   : > { %1048 = vmatmul.mubr.f32.gmra.mrb[20].mxu0 %v857_v11  ;;  %1128 = vmatmul.mubr.f32.gmra.mrb[20].mxu1 %v889_v12  ;;  %v1194_v11 = vld [vmem:[#allocation2 + $0x20] sm:$0xff] }
 0x2ee   : > { %1052 = vmatprep.mubr.f32.mxu0 %v860_v13  ;;  %1132 = vmatprep.mubr.f32.mxu1 %v892_v14  ;;  %v1210_v12 = vld [vmem:[#allocation2 + $0xa0] sm:$0xff] }
 0x2f1   : > { %1053 = vmatmul.mubr.f32.gmra.mrb[22].mxu0 %v859_v15  ;;  %1133 = vmatmul.mubr.f32.gmra.mrb[22].mxu1 %v891_v16 }
 0x2f2   : > { %1057 = vmatprep.mubr.f32.mxu0 %v862_v17  ;;  %1137 = vmatprep.mubr.f32.mxu1 %v894_v18 }
 0x2f5   : > { %1058 = vmatmul.mubr.f32.gmra.mrb[24].mxu0 %v861_v19  ;;  %1138 = vmatmul.mubr.f32.gmra.mrb[24].mxu1 %v893_v20  ;;  %v1226_v19 = vmul.f32 0.1, %v1194_v11  ;;  %v1242_v20 = vmul.f32 0.1, %v1210_v12 }
 0x2f6   : > { %1062 = vmatprep.mubr.f32.mxu0 %v864_v21  ;;  %1142 = vmatprep.mubr.f32.mxu1 %v896_v22 }
 0x2f9   : > { %1063 = vmatmul.mubr.f32.gmra.mrb[26].mxu0 %v863_v23  ;;  %1143 = vmatmul.mubr.f32.gmra.mrb[26].mxu1 %v895_v24  ;;  %v1195_v23 = vld [vmem:[#allocation2 + $0x28] sm:$0xff] }
 0x2fa   : > { %1067 = vmatprep.mubr.f32.mxu0 %v866_v25  ;;  %1147 = vmatprep.mubr.f32.mxu1 %v898_v26  ;;  %v1211_v24 = vld [vmem:[#allocation2 + $0xa8] sm:$0xff] }
 0x2fd   : > { %1068 = vmatmul.mubr.f32.gmra.mrb[28].mxu0 %v865_v27  ;;  %1148 = vmatmul.mubr.f32.gmra.mrb[28].mxu1 %v897_v28 }
 0x2fe   : > { %1072 = vmatprep.mubr.f32.mxu0 %v868_v29  ;;  %1152 = vmatprep.mubr.f32.mxu1 %v900_v30 }
 0x301   : > { %1073 = vmatmul.mubr.f32.gmra.mrb[30].mxu0 %v867_v31  ;;  %1153 = vmatmul.mubr.f32.gmra.mrb[30].mxu1 %v899_v32  ;;  %v1227_v31 = vmul.f32 0.1, %v1195_v23  ;;  %v1243_v32 = vmul.f32 0.1, %v1211_v24 }
 0x398   : > { %v999_v37 = vpop.f32.mrb[0].mxu0  ;;  %v1079_v38 = vpop.f32.mrb[0].mxu1 }
 0x399   : > { %v1158_v41 = vmul.f32 0.9, %v999_v37  ;;  %v1174_v42 = vmul.f32 0.9, %v1079_v38  ;;  %v1001_v43 = vpop.f32.mrb[1].mxu0  ;;  %v1081_v44 = vpop.f32.mrb[1].mxu1 }
 0x39b   : > { %v2808_v45 = vadd.f32 %v1222_v35, %v1158_v41  ;;  %v2810_v46 = vadd.f32 %v1238_v36, %v1174_v42  ;;  %v1196_v35 = vld [vmem:[#allocation2 + $0x30] sm:$0xff] }
 0x39c   : > { %v1004_v49 = vpop.f32.mrb[2].mxu0  ;;  %v1084_v50 = vpop.f32.mrb[2].mxu1  ;;  %v1212_v36 = vld [vmem:[#allocation2 + $0xb0] sm:$0xff]  ;;  %v1228_v43 = vmul.f32 0.1, %v1196_v35 }
 0x39d   : > { %1286 = vst [vmem:[#allocation3] sm:$0xff] %v2808_v45  ;;  %1302 = vst [vmem:[#allocation3 + $0x80] sm:$0xff] %v2810_v46  ;;  %v1159_v53 = vmul.f32 0.9, %v1004_v49  ;;  %v1175_v54 = vmul.f32 0.9, %v1084_v50 }
 0x39e   : > { %v1006_v55 = vpop.f32.mrb[3].mxu0  ;;  %v1086_v56 = vpop.f32.mrb[3].mxu1  ;;  %v1244_v44 = vmul.f32 0.1, %v1212_v36  ;;  %v1197_v49 = vld [vmem:[#allocation2 + $0x38] sm:$0xff] }
 0x39f   : > { %v2814_v57 = vadd.f32 %v1223_v47, %v1159_v53  ;;  %v2816_v58 = vadd.f32 %v1239_v48, %v1175_v54  ;;  %v1213_v50 = vld [vmem:[#allocation2 + $0xb8] sm:$0xff] }
 0x3a0   : > { %v1009_v61 = vpop.f32.mrb[4].mxu0  ;;  %v1089_v62 = vpop.f32.mrb[4].mxu1 }
 0x3a1   : > { %1287 = vst [vmem:[#allocation3 + $0x8] sm:$0xff] %v2814_v57  ;;  %1303 = vst [vmem:[#allocation3 + $0x88] sm:$0xff] %v2816_v58  ;;  %v1160_v1 = vmul.f32 0.9, %v1009_v61  ;;  %v1176_v2 = vmul.f32 0.9, %v1089_v62 }
 0x3a2   : > { %v1011_v3 = vpop.f32.mrb[5].mxu0  ;;  %v1091_v4 = vpop.f32.mrb[5].mxu1 }
 0x3a3   : > { %v2820_v5 = vadd.f32 %v1224_v59, %v1160_v1  ;;  %v2822_v6 = vadd.f32 %v1240_v60, %v1176_v2  ;;  %v1229_v59 = vmul.f32 0.1, %v1197_v49  ;;  %v1245_v60 = vmul.f32 0.1, %v1213_v50 }
 0x3a4   : > { %v1014_v9 = vpop.f32.mrb[6].mxu0  ;;  %v1094_v10 = vpop.f32.mrb[6].mxu1 }
 0x3a5   : > { %3351 = vst [vmem:[#allocation17_spill] sm:$0xff] %v2822_v6  ;;  %1288 = vst [vmem:[#allocation3 + $0x10] sm:$0xff] %v2820_v5  ;;  %v1161_v13 = vmul.f32 0.9, %v1014_v9  ;;  %v1177_v14 = vmul.f32 0.9, %v1094_v10 }
 0x3a6   : > { %1304 = vst [vmem:[#allocation3 + $0x90] sm:$0xff] %v2822_v6  ;;  %v1016_v15 = vpop.f32.mrb[7].mxu0  ;;  %v1096_v16 = vpop.f32.mrb[7].mxu1  ;;  %v1230_v9 = vmul.f32 0.1, %v1198_v63 }
 0x3a7   : > { %v2826_v17 = vadd.f32 %v1225_v7, %v1161_v13  ;;  %v2828_v18 = vadd.f32 %v1241_v8, %v1177_v14  ;;  %v1246_v10 = vmul.f32 0.1, %v1214_v0  ;;  %v1199_v13 = vld [vmem:[#allocation2 + $0x48] sm:$0xff] }
 0x3a8   : > { %v1019_v21 = vpop.f32.mrb[8].mxu0  ;;  %v1099_v22 = vpop.f32.mrb[8].mxu1  ;;  %v1215_v14 = vld [vmem:[#allocation2 + $0xc8] sm:$0xff]  ;;  %v1231_v23 = vmul.f32 0.1, %v1199_v13 }
 0x3a9   : > { %3352 = vst [vmem:[#allocation18_spill] sm:$0xff] %v2828_v18  ;;  %1289 = vst [vmem:[#allocation3 + $0x18] sm:$0xff] %v2826_v17  ;;  %v1162_v25 = vmul.f32 0.9, %v1019_v21  ;;  %v1178_v26 = vmul.f32 0.9, %v1099_v22 }
 0x3aa   : > { %1305 = vst [vmem:[#allocation3 + $0x98] sm:$0xff] %v2828_v18  ;;  %v1021_v27 = vpop.f32.mrb[9].mxu0  ;;  %v1101_v28 = vpop.f32.mrb[9].mxu1  ;;  %v1247_v24 = vmul.f32 0.1, %v1215_v14  ;;  %v1203_v13 = vld [vmem:[#allocation2 + $0x68] sm:$0xff] }
 0x3ab   : > { %v2832_v29 = vadd.f32 %v1226_v19, %v1162_v25  ;;  %v2834_v30 = vadd.f32 %v1242_v20, %v1178_v26  ;;  %v1200_v27 = vld [vmem:[#allocation2 + $0x50] sm:$0xff]  ;;  %v1219_v14 = vld [vmem:[#allocation2 + $0xe8] sm:$0xff] }
 0x3ac   : > { %v1024_v33 = vpop.f32.mrb[10].mxu0  ;;  %v1104_v34 = vpop.f32.mrb[10].mxu1  ;;  %v1216_v28 = vld [vmem:[#allocation2 + $0xd0] sm:$0xff] }
 0x3ad   : > { %3353 = vst [vmem:[#allocation19_spill] sm:$0xff] %v2834_v30  ;;  %1290 = vst [vmem:[#allocation3 + $0x20] sm:$0xff] %v2832_v29  ;;  %v1163_v37 = vmul.f32 0.9, %v1024_v33  ;;  %v1179_v38 = vmul.f32 0.9, %v1104_v34 }
 0x3ae   : > { %1306 = vst [vmem:[#allocation3 + $0xa0] sm:$0xff] %v2834_v30  ;;  %v1026_v39 = vpop.f32.mrb[11].mxu0  ;;  %v1106_v40 = vpop.f32.mrb[11].mxu1 }
 0x3af   : > { %v2838_v41 = vadd.f32 %v1227_v31, %v1163_v37  ;;  %v2840_v42 = vadd.f32 %v1243_v32, %v1179_v38  ;;  %v1232_v37 = vmul.f32 0.1, %v1200_v27  ;;  %v1248_v38 = vmul.f32 0.1, %v1216_v28 }
 0x3b0   : > { %v1029_v47 = vpop.f32.mrb[12].mxu0  ;;  %v1109_v48 = vpop.f32.mrb[12].mxu1 }
 0x3b1   : > { %3354 = vst [vmem:[#allocation20_spill] sm:$0xff] %v2840_v42  ;;  %1291 = vst [vmem:[#allocation3 + $0x28] sm:$0xff] %v2838_v41  ;;  %v1164_v51 = vmul.f32 0.9, %v1029_v47  ;;  %v1180_v52 = vmul.f32 0.9, %v1109_v48 }
 0x3b2   : > { %1307 = vst [vmem:[#allocation3 + $0xa8] sm:$0xff] %v2840_v42  ;;  %v1031_v53 = vpop.f32.mrb[13].mxu0  ;;  %v1111_v54 = vpop.f32.mrb[13].mxu1 }
 0x3b3   : > { %v2844_v55 = vadd.f32 %v1228_v43, %v1164_v51  ;;  %v2846_v56 = vadd.f32 %v1244_v44, %v1180_v52  ;;  %v1201_v43 = vld [vmem:[#allocation2 + $0x58] sm:$0xff] }
 0x3b4   : > { %v1034_v61 = vpop.f32.mrb[14].mxu0  ;;  %v1114_v62 = vpop.f32.mrb[14].mxu1  ;;  %v1217_v44 = vld [vmem:[#allocation2 + $0xd8] sm:$0xff]  ;;  %v1233_v53 = vmul.f32 0.1, %v1201_v43 }
 0x3b5   : > { %3355 = vst [vmem:[#allocation21_spill] sm:$0xff] %v2846_v56  ;;  %1292 = vst [vmem:[#allocation3 + $0x30] sm:$0xff] %v2844_v55  ;;  %v1165_v1 = vmul.f32 0.9, %v1034_v61  ;;  %v1181_v2 = vmul.f32 0.9, %v1114_v62 }
 0x3b6   : > { %1308 = vst [vmem:[#allocation3 + $0xb0] sm:$0xff] %v2846_v56  ;;  %v1036_v3 = vpop.f32.mrb[15].mxu0  ;;  %v1116_v4 = vpop.f32.mrb[15].mxu1  ;;  %v1249_v54 = vmul.f32 0.1, %v1217_v44  ;;  %v1202_v61 = vld [vmem:[#allocation2 + $0x60] sm:$0xff] }
 0x3b7   : > { %v2850_v7 = vadd.f32 %v1229_v59, %v1165_v1  ;;  %v2852_v8 = vadd.f32 %v1245_v60, %v1181_v2  ;;  %v1218_v62 = vld [vmem:[#allocation2 + $0xe0] sm:$0xff] }
 0x3b8   : > { %v1039_v11 = vpop.f32.mrb[16].mxu0  ;;  %v1119_v12 = vpop.f32.mrb[16].mxu1 }
 0x3b9   : > { %3356 = vst [vmem:[#allocation22_spill] sm:$0xff] %v2852_v8  ;;  %1293 = vst [vmem:[#allocation3 + $0x38] sm:$0xff] %v2850_v7  ;;  %v1166_v15 = vmul.f32 0.9, %v1039_v11  ;;  %v1182_v16 = vmul.f32 0.9, %v1119_v12 }
 0x3ba   : > { %1309 = vst [vmem:[#allocation3 + $0xb8] sm:$0xff] %v2852_v8  ;;  %v1041_v19 = vpop.f32.mrb[17].mxu0  ;;  %v1121_v20 = vpop.f32.mrb[17].mxu1 }
 0x3bb   : > { %v2856_v21 = vadd.f32 %v1230_v9, %v1166_v15  ;;  %v2858_v22 = vadd.f32 %v1246_v10, %v1182_v16  ;;  %v1234_v9 = vmul.f32 0.1, %v1202_v61  ;;  %v1250_v10 = vmul.f32 0.1, %v1218_v62 }
 0x3bc   : > { %v1044_v25 = vpop.f32.mrb[18].mxu0  ;;  %v1124_v26 = vpop.f32.mrb[18].mxu1 }
 0x3bd   : > { %3357 = vst [vmem:[#allocation23_spill] sm:$0xff] %v2858_v22  ;;  %1294 = vst [vmem:[#allocation3 + $0x40] sm:$0xff] %v2856_v21  ;;  %v1167_v31 = vmul.f32 0.9, %v1044_v25  ;;  %v1183_v32 = vmul.f32 0.9, %v1124_v26 }
 0x3be   : > { %1310 = vst [vmem:[#allocation3 + $0xc0] sm:$0xff] %v2858_v22  ;;  %v1046_v33 = vpop.f32.mrb[19].mxu0  ;;  %v1126_v34 = vpop.f32.mrb[19].mxu1  ;;  %v1235_v25 = vmul.f32 0.1, %v1203_v13 }
 0x3bf   : > { %v2862_v35 = vadd.f32 %v1231_v23, %v1167_v31  ;;  %v2864_v36 = vadd.f32 %v1247_v24, %v1183_v32  ;;  %v1251_v26 = vmul.f32 0.1, %v1219_v14  ;;  %v1204_v31 = vld [vmem:[#allocation2 + $0x70] sm:$0xff] }
 0x3c0   : > { %v1049_v39 = vpop.f32.mrb[20].mxu0  ;;  %v1129_v40 = vpop.f32.mrb[20].mxu1  ;;  %v1220_v32 = vld [vmem:[#allocation2 + $0xf0] sm:$0xff]  ;;  %v1236_v43 = vmul.f32 0.1, %v1204_v31 }
 0x3c1   : > { %3358 = vst [vmem:[#allocation24_spill] sm:$0xff] %v2864_v36  ;;  %1295 = vst [vmem:[#allocation3 + $0x48] sm:$0xff] %v2862_v35  ;;  %v1168_v47 = vmul.f32 0.9, %v1049_v39  ;;  %v1184_v48 = vmul.f32 0.9, %v1129_v40 }
 0x3c2   : > { %1311 = vst [vmem:[#allocation3 + $0xc8] sm:$0xff] %v2864_v36  ;;  %v1051_v49 = vpop.f32.mrb[21].mxu0  ;;  %v1131_v50 = vpop.f32.mrb[21].mxu1  ;;  %v1252_v44 = vmul.f32 0.1, %v1220_v32 }
 0x3c3   : > { %v2868_v51 = vadd.f32 %v1232_v37, %v1168_v47  ;;  %v2870_v52 = vadd.f32 %v1248_v38, %v1184_v48  ;;  %v1205_v49 = vld [vmem:[#allocation2 + $0x78] sm:$0xff] }
 0x3c4   : > { %v1054_v59 = vpop.f32.mrb[22].mxu0  ;;  %v1134_v60 = vpop.f32.mrb[22].mxu1  ;;  %v1221_v50 = vld [vmem:[#allocation2 + $0xf8] sm:$0xff] }
 0x3c5   : > { %3359 = vst [vmem:[#allocation25_spill] sm:$0xff] %v2870_v52  ;;  %1296 = vst [vmem:[#allocation3 + $0x50] sm:$0xff] %v2868_v51  ;;  %v1169_v63 = vmul.f32 0.9, %v1054_v59  ;;  %v1185_v0 = vmul.f32 0.9, %v1134_v60 }
 0x3c6   : > { %1312 = vst [vmem:[#allocation3 + $0xd0] sm:$0xff] %v2870_v52  ;;  %v1056_v1 = vpop.f32.mrb[23].mxu0  ;;  %v1136_v2 = vpop.f32.mrb[23].mxu1 }
 0x3c7   : > { %v2874_v3 = vadd.f32 %v1233_v53, %v1169_v63  ;;  %v2876_v4 = vadd.f32 %v1249_v54, %v1185_v0  ;;  %v1237_v63 = vmul.f32 0.1, %v1205_v49  ;;  %v1253_v0 = vmul.f32 0.1, %v1221_v50 }
 0x3c8   : > { %v1059_v11 = vpop.f32.mrb[24].mxu0  ;;  %v1139_v12 = vpop.f32.mrb[24].mxu1 }
 0x3c9   : > { %3360 = vst [vmem:[#allocation26_spill] sm:$0xff] %v2876_v4  ;;  %1297 = vst [vmem:[#allocation3 + $0x58] sm:$0xff] %v2874_v3  ;;  %v1170_v15 = vmul.f32 0.9, %v1059_v11  ;;  %v1186_v16 = vmul.f32 0.9, %v1139_v12 }
 0x3ca   : > { %1313 = vst [vmem:[#allocation3 + $0xd8] sm:$0xff] %v2876_v4  ;;  %v1061_v19 = vpop.f32.mrb[25].mxu0  ;;  %v1141_v20 = vpop.f32.mrb[25].mxu1 }
 0x3cb   : > { %v2880_v23 = vadd.f32 %v1234_v9, %v1170_v15  ;;  %v2882_v24 = vadd.f32 %v1250_v10, %v1186_v16 }
 0x3cc   : > { %v1064_v27 = vpop.f32.mrb[26].mxu0  ;;  %v1144_v28 = vpop.f32.mrb[26].mxu1 }
 0x3cd   : > { %3361 = vst [vmem:[#allocation27_spill] sm:$0xff] %v2882_v24  ;;  %1298 = vst [vmem:[#allocation3 + $0x60] sm:$0xff] %v2880_v23  ;;  %v1171_v33 = vmul.f32 0.9, %v1064_v27  ;;  %v1187_v34 = vmul.f32 0.9, %v1144_v28 }
 0x3ce   : > { %1314 = vst [vmem:[#allocation3 + $0xe0] sm:$0xff] %v2882_v24  ;;  %v1066_v37 = vpop.f32.mrb[27].mxu0  ;;  %v1146_v38 = vpop.f32.mrb[27].mxu1 }
 0x3cf   : > { %v2886_v39 = vadd.f32 %v1235_v25, %v1171_v33  ;;  %v2888_v40 = vadd.f32 %v1251_v26, %v1187_v34 }
 0x3d0   : > { %v1069_v47 = vpop.f32.mrb[28].mxu0  ;;  %v1149_v48 = vpop.f32.mrb[28].mxu1 }
 0x3d1   : > { %3362 = vst [vmem:[#allocation28_spill] sm:$0xff] %v2888_v40  ;;  %1299 = vst [vmem:[#allocation3 + $0x68] sm:$0xff] %v2886_v39  ;;  %v1172_v53 = vmul.f32 0.9, %v1069_v47  ;;  %v1188_v54 = vmul.f32 0.9, %v1149_v48 }
 0x3d2   : > { %1315 = vst [vmem:[#allocation3 + $0xe8] sm:$0xff] %v2888_v40  ;;  %v1071_v59 = vpop.f32.mrb[29].mxu0  ;;  %v1151_v60 = vpop.f32.mrb[29].mxu1 }
 0x3d3   : > { %v2892_v61 = vadd.f32 %v1236_v43, %v1172_v53  ;;  %v2894_v62 = vadd.f32 %v1252_v44, %v1188_v54 }
 0x3d4   : > { %v1074_v1 = vpop.f32.mrb[30].mxu0  ;;  %v1154_v2 = vpop.f32.mrb[30].mxu1  ;;  %1321 = sbr.rel (%p1830_p7) target bundleno = 1374 (0x55e), region = 60 }
 0x3d5   : > { %3363 = vst [vmem:[#allocation29_spill] sm:$0xff] %v2894_v62  ;;  %1300 = vst [vmem:[#allocation3 + $0x70] sm:$0xff] %v2892_v61  ;;  %v1173_v9 = vmul.f32 0.9, %v1074_v1  ;;  %v1189_v10 = vmul.f32 0.9, %v1154_v2 }
 0x3d6   : > { %1316 = vst [vmem:[#allocation3 + $0xf0] sm:$0xff] %v2894_v62  ;;  %v1076_v11 = vpop.f32.mrb[31].mxu0  ;;  %v1156_v12 = vpop.f32.mrb[31].mxu1 }
 0x3d7   : > { %v2898_v13 = vadd.f32 %v1237_v63, %v1173_v9  ;;  %v2900_v14 = vadd.f32 %v1253_v0, %v1189_v10 }
 0x3d9   : > { %3364 = vst [vmem:[#allocation30_spill] sm:$0xff] %v2900_v14  ;;  %1301 = vst [vmem:[#allocation3 + $0x78] sm:$0xff] %v2898_v13 }
 0x3da   : > { %1317 = vst [vmem:[#allocation3 + $0xf8] sm:$0xff] %v2900_v14 }
 0x3db   : > { %v1322_v15 = vlaneseq }
 0x3dd   : > { %v2905_v16 = vand.u32 127, %v1322_v15 }
 0x3df   : > { %vm1324_vm0 = vcmp.lt.s32.totalorder %v2905_v16, 16 }
 0x3e0   : > { %v2911_v19 = vsel %vm1324_vm0, %v2808_v45, -inf  ;;  %v2916_v20 = vsel %vm1324_vm0, %v2820_v5, -inf  ;;  %v2923_v25 = vsel %vm1324_vm0, %v2814_v57, -inf  ;;  %v2928_v26 = vsel %vm1324_vm0, %v2826_v17, -inf }
 0x3e1   : > { %1357 = vmax.xlane.f32.xlu0 %v2911_v19  ;;  %1361 = vmax.xlane.f32.xlu1 %v2916_v20  ;;  %v2935_v27 = vsel %vm1324_vm0, %v2832_v29, -inf  ;;  %v2940_v28 = vsel %vm1324_vm0, %v2838_v41, -inf  ;;  %v2947_v31 = vsel %vm1324_vm0, %v2844_v55, -inf  ;;  %v2952_v32 = vsel %vm1324_vm0, %v2850_v7, -inf }
 0x3e2   : > { %v2959_v33 = vsel %vm1324_vm0, %v2856_v21, -inf  ;;  %v2964_v34 = vsel %vm1324_vm0, %v2862_v35, -inf  ;;  %v2971_v37 = vsel %vm1324_vm0, %v2868_v51, -inf  ;;  %v2976_v38 = vsel %vm1324_vm0, %v2874_v3, -inf }
 0x3e3   : > { %v2983_v43 = vsel %vm1324_vm0, %v2880_v23, -inf  ;;  %v2988_v44 = vsel %vm1324_vm0, %v2886_v39, -inf  ;;  %v2995_v47 = vsel %vm1324_vm0, %v2892_v61, -inf  ;;  %v3000_v48 = vsel %vm1324_vm0, %v2898_v13, -inf }
 0x3e4   : > { %v3007_v49 = vsel %vm1324_vm0, %v2810_v46, -inf  ;;  %v3012_v50 = vsel %vm1324_vm0, %v2816_v58, -inf  ;;  %v3019_v53 = vsel %vm1324_vm0, %v2822_v6, -inf  ;;  %v3024_v54 = vsel %vm1324_vm0, %v2828_v18, -inf }
 0x3e5   : > { %1359 = vmax.xlane.f32.xlu0 %v2923_v25  ;;  %1363 = vmax.xlane.f32.xlu1 %v2928_v26  ;;  %v3031_v59 = vsel %vm1324_vm0, %v2834_v30, -inf  ;;  %v3036_v60 = vsel %vm1324_vm0, %v2840_v42, -inf  ;;  %v3043_v63 = vsel %vm1324_vm0, %v2846_v56, -inf  ;;  %v3048_v0 = vsel %vm1324_vm0, %v2852_v8, -inf }
 0x3e6   : > { %v3055_v1 = vsel %vm1324_vm0, %v2858_v22, -inf  ;;  %v3060_v2 = vsel %vm1324_vm0, %v2864_v36, -inf  ;;  %v3067_v9 = vsel %vm1324_vm0, %v2870_v52, -inf  ;;  %v3072_v10 = vsel %vm1324_vm0, %v2876_v4, -inf }
 0x3e7   : > { %v3079_v11 = vsel %vm1324_vm0, %v2882_v24, -inf  ;;  %v3084_v12 = vsel %vm1324_vm0, %v2888_v40, -inf  ;;  %v3091_v15 = vsel %vm1324_vm0, %v2894_v62, -inf  ;;  %v3096_v4 = vsel %vm1324_vm0, %v2900_v14, -inf }
 0x3e9   : > { %1365 = vmax.xlane.f32.xlu0 %v2935_v27  ;;  %1367 = vmax.xlane.f32.xlu1 %v2940_v28 }
 0x3ed   : > { %1369 = vmax.xlane.f32.xlu0 %v2947_v31  ;;  %1371 = vmax.xlane.f32.xlu1 %v2952_v32 }
 0x3f1   : > { %1373 = vmax.xlane.f32.xlu0 %v2959_v33  ;;  %1375 = vmax.xlane.f32.xlu1 %v2964_v34 }
 0x3f5   : > { %1377 = vmax.xlane.f32.xlu0 %v2971_v37  ;;  %1379 = vmax.xlane.f32.xlu1 %v2976_v38 }
 0x3f9   : > { %1381 = vmax.xlane.f32.xlu0 %v2983_v43  ;;  %1383 = vmax.xlane.f32.xlu1 %v2988_v44 }
 0x3fd   : > { %1385 = vmax.xlane.f32.xlu0 %v2995_v47  ;;  %1387 = vmax.xlane.f32.xlu1 %v3000_v48 }
 0x401   : > { %1389 = vmax.xlane.f32.xlu0 %v3007_v49  ;;  %1391 = vmax.xlane.f32.xlu1 %v3012_v50 }
 0x405   : > { %1393 = vmax.xlane.f32.xlu0 %v3019_v53  ;;  %1395 = vmax.xlane.f32.xlu1 %v3024_v54 }
 0x409   : > { %1397 = vmax.xlane.f32.xlu0 %v3031_v59  ;;  %1399 = vmax.xlane.f32.xlu1 %v3036_v60 }
 0x40d   : > { %1401 = vmax.xlane.f32.xlu0 %v3043_v63  ;;  %1403 = vmax.xlane.f32.xlu1 %v3048_v0 }
 0x411   : > { %1405 = vmax.xlane.f32.xlu0 %v3055_v1  ;;  %1407 = vmax.xlane.f32.xlu1 %v3060_v2 }
 0x415   : > { %1409 = vmax.xlane.f32.xlu0 %v3067_v9  ;;  %1411 = vmax.xlane.f32.xlu1 %v3072_v10 }
 0x419   : > { %1413 = vmax.xlane.f32.xlu0 %v3079_v11  ;;  %1415 = vmax.xlane.f32.xlu1 %v3084_v12 }
 0x41d   : > { %1417 = vmax.xlane.f32.xlu0 %v3091_v15  ;;  %1419 = vmax.xlane.f32.xlu1 %v3096_v4 }
 0x46e   : > { %v3100_v40 = vpop.xlane.xlu0 %1357  ;;  %v3102_v24 = vpop.xlane.xlu1 %1361 }
 0x46f   : > { %v1421_v52 = vsub.f32 %v2911_v19, %v3100_v40  ;;  %v1423_v62 = vsub.f32 %v2916_v20, %v3102_v24 }
 0x471   : > { %v1453_v36 = vmul.f32 1.442695, %v1421_v52  ;;  %v1457_v22 = vmul.f32 1.442695, %v1423_v62 }
 0x472   : > { %v3108_v8 = vpop.xlane.xlu0 %1359  ;;  %v3110_v16 = vpop.xlane.xlu1 %1363 }
 0x473   : > { %2298 = vpow2.f32 %v1453_v36  ;;  %v1422_v14 = vsub.f32 %v2923_v25, %v3108_v8  ;;  %v1424_v56 = vsub.f32 %v2928_v26, %v3110_v16 }
 0x474   : > { %2300 = vpow2.f32 %v1457_v22 }
 0x475   : > { %v1455_v42 = vmul.f32 1.442695, %v1422_v14  ;;  %v1459_v30 = vmul.f32 1.442695, %v1424_v56 }
 0x476   : > { %v3116_v19 = vpop.xlane.xlu0 %1365  ;;  %v3118_v18 = vpop.xlane.xlu1 %1367 }
 0x477   : > { %2302 = vpow2.f32 %v1455_v42  ;;  %v1425_v52 = vsub.f32 %v2935_v27, %v3116_v19  ;;  %v1426_v36 = vsub.f32 %v2940_v28, %v3118_v18 }
 0x478   : > { %2304 = vpow2.f32 %v1459_v30 }
 0x479   : > { %v1461_v62 = vmul.f32 1.442695, %v1425_v52  ;;  %v1463_v20 = vmul.f32 1.442695, %v1426_v36 }
 0x47a   : > { %v3124_v25 = vpop.xlane.xlu0 %1369  ;;  %v3126_v26 = vpop.xlane.xlu1 %1371 }
 0x47b   : > { %2306 = vpow2.f32 %v1461_v62  ;;  %v1427_v56 = vsub.f32 %v2947_v31, %v3124_v25  ;;  %v1428_v42 = vsub.f32 %v2952_v32, %v3126_v26 }
 0x47c   : > { %2308 = vpow2.f32 %v1463_v20 }
 0x47d   : > { %v2299_v22 = vpop.eup %2298  ;;  %v1465_v14 = vmul.f32 1.442695, %v1427_v56  ;;  %v1467_v27 = vmul.f32 1.442695, %v1428_v42 }
 0x47e   : > { %1517 = vadd.xlane.f32.xlu0 %v2299_v22  ;;  %v3132_v28 = vpop.xlane.xlu0 %1373  ;;  %v3134_v30 = vpop.xlane.xlu1 %1375 }
 0x47f   : > { %v2301_v52 = vpop.eup %2300  ;;  %2310 = vpow2.f32 %v1465_v14  ;;  %v1429_v36 = vsub.f32 %v2959_v33, %v3132_v28  ;;  %v1430_v31 = vsub.f32 %v2964_v34, %v3134_v30 }
 0x480   : > { %2312 = vpow2.f32 %v1467_v27 }
 0x481   : > { %v2303_v62 = vpop.eup %2302  ;;  %v1469_v32 = vmul.f32 1.442695, %v1429_v36  ;;  %v1471_v6 = vmul.f32 1.442695, %v1430_v31 }
 0x482   : > { %1521 = vadd.xlane.f32.xlu0 %v2301_v52  ;;  %1519 = vadd.xlane.f32.xlu1 %v2303_v62  ;;  %v3140_v20 = vpop.xlane.xlu0 %1377  ;;  %v3142_v56 = vpop.xlane.xlu1 %1379 }
 0x483   : > { %v2305_v42 = vpop.eup %2304  ;;  %2314 = vpow2.f32 %v1469_v32  ;;  %v1431_v22 = vsub.f32 %v2971_v37, %v3140_v20  ;;  %v1432_v33 = vsub.f32 %v2976_v38, %v3142_v56 }
 0x484   : > { %2316 = vpow2.f32 %v1471_v6 }
 0x485   : > { %v2307_v14 = vpop.eup %2306  ;;  %v1473_v34 = vmul.f32 1.442695, %v1431_v22  ;;  %v1475_v27 = vmul.f32 1.442695, %v1432_v33 }
 0x486   : > { %1523 = vadd.xlane.f32.xlu1 %v2305_v42  ;;  %1525 = vadd.xlane.f32.xlu0 %v2307_v14  ;;  %v3148_v52 = vpop.xlane.xlu0 %1381  ;;  %v3150_v36 = vpop.xlane.xlu1 %1383 }
 0x487   : > { %v2309_v31 = vpop.eup %2308  ;;  %2318 = vpow2.f32 %v1473_v34  ;;  %v1433_v62 = vsub.f32 %v2983_v43, %v3148_v52  ;;  %v1434_v37 = vsub.f32 %v2988_v44, %v3150_v36 }
 0x488   : > { %2320 = vpow2.f32 %v1475_v27 }
 0x489   : > { %v2311_v32 = vpop.eup %2310  ;;  %v1477_v38 = vmul.f32 1.442695, %v1433_v62  ;;  %v1479_v6 = vmul.f32 1.442695, %v1434_v37 }
 0x48a   : > { %1527 = vadd.xlane.f32.xlu1 %v2309_v31  ;;  %1529 = vadd.xlane.f32.xlu0 %v2311_v32  ;;  %v3156_v42 = vpop.xlane.xlu0 %1385  ;;  %v3158_v22 = vpop.xlane.xlu1 %1387 }
 0x48b   : > { %v2313_v33 = vpop.eup %2312  ;;  %2322 = vpow2.f32 %v1477_v38  ;;  %v1435_v14 = vsub.f32 %v2995_v47, %v3156_v42  ;;  %v1436_v43 = vsub.f32 %v3000_v48, %v3158_v22 }
 0x48c   : > { %2324 = vpow2.f32 %v1479_v6 }
 0x48d   : > { %v2315_v34 = vpop.eup %2314  ;;  %v1481_v44 = vmul.f32 1.442695, %v1435_v14  ;;  %v1483_v27 = vmul.f32 1.442695, %v1436_v43 }
 0x48e   : > { %1531 = vadd.xlane.f32.xlu1 %v2313_v33  ;;  %1533 = vadd.xlane.f32.xlu0 %v2315_v34  ;;  %v3164_v31 = vpop.xlane.xlu0 %1389  ;;  %v3166_v62 = vpop.xlane.xlu1 %1391 }
 0x48f   : > { %v2317_v37 = vpop.eup %2316  ;;  %2326 = vpow2.f32 %v1481_v44  ;;  %v1437_v32 = vsub.f32 %v3007_v49, %v3164_v31  ;;  %v1438_v47 = vsub.f32 %v3012_v50, %v3166_v62 }
 0x490   : > { %2328 = vpow2.f32 %v1483_v27 }
 0x491   : > { %v2319_v38 = vpop.eup %2318  ;;  %v1485_v48 = vmul.f32 1.442695, %v1437_v32  ;;  %v1487_v6 = vmul.f32 1.442695, %v1438_v47 }
 0x492   : > { %1535 = vadd.xlane.f32.xlu1 %v2317_v37  ;;  %1537 = vadd.xlane.f32.xlu0 %v2319_v38  ;;  %v3172_v33 = vpop.xlane.xlu0 %1393  ;;  %v3174_v14 = vpop.xlane.xlu1 %1395 }
 0x493   : > { %v2321_v43 = vpop.eup %2320  ;;  %2330 = vpow2.f32 %v1485_v48  ;;  %v1439_v34 = vsub.f32 %v3019_v53, %v3172_v33  ;;  %v1440_v49 = vsub.f32 %v3024_v54, %v3174_v14 }
 0x494   : > { %2332 = vpow2.f32 %v1487_v6 }
 0x495   : > { %v2323_v44 = vpop.eup %2322  ;;  %v1489_v50 = vmul.f32 1.442695, %v1439_v34  ;;  %v1491_v27 = vmul.f32 1.442695, %v1440_v49 }
 0x496   : > { %1539 = vadd.xlane.f32.xlu1 %v2321_v43  ;;  %1541 = vadd.xlane.f32.xlu0 %v2323_v44  ;;  %v3180_v37 = vpop.xlane.xlu0 %1397  ;;  %v3182_v32 = vpop.xlane.xlu1 %1399 }
 0x497   : > { %v2325_v47 = vpop.eup %2324  ;;  %2334 = vpow2.f32 %v1489_v50  ;;  %v1441_v38 = vsub.f32 %v3031_v59, %v3180_v37  ;;  %v1442_v53 = vsub.f32 %v3036_v60, %v3182_v32 }
 0x498   : > { %2336 = vpow2.f32 %v1491_v27 }
 0x499   : > { %v2327_v48 = vpop.eup %2326  ;;  %v1493_v54 = vmul.f32 1.442695, %v1441_v38  ;;  %v1495_v6 = vmul.f32 1.442695, %v1442_v53 }
 0x49a   : > { %1543 = vadd.xlane.f32.xlu1 %v2325_v47  ;;  %1545 = vadd.xlane.f32.xlu0 %v2327_v48  ;;  %v3188_v43 = vpop.xlane.xlu0 %1401  ;;  %v3190_v34 = vpop.xlane.xlu1 %1403 }
 0x49b   : > { %v2329_v49 = vpop.eup %2328  ;;  %2338 = vpow2.f32 %v1493_v54  ;;  %v1443_v44 = vsub.f32 %v3043_v63, %v3188_v43  ;;  %v1444_v59 = vsub.f32 %v3048_v0, %v3190_v34 }
 0x49c   : > { %2340 = vpow2.f32 %v1495_v6 }
 0x49d   : > { %v2331_v50 = vpop.eup %2330  ;;  %v1497_v60 = vmul.f32 1.442695, %v1443_v44  ;;  %v1499_v27 = vmul.f32 1.442695, %v1444_v59 }
 0x49e   : > { %1547 = vadd.xlane.f32.xlu1 %v2329_v49  ;;  %1549 = vadd.xlane.f32.xlu0 %v2331_v50  ;;  %v3196_v47 = vpop.xlane.xlu0 %1405  ;;  %v3198_v38 = vpop.xlane.xlu1 %1407 }
 0x49f   : > { %v2333_v53 = vpop.eup %2332  ;;  %2342 = vpow2.f32 %v1497_v60  ;;  %v1445_v48 = vsub.f32 %v3055_v1, %v3196_v47  ;;  %v1446_v63 = vsub.f32 %v3060_v2, %v3198_v38 }
 0x4a0   : > { %2344 = vpow2.f32 %v1499_v27 }
 0x4a1   : > { %v2335_v54 = vpop.eup %2334  ;;  %v1501_v0 = vmul.f32 1.442695, %v1445_v48  ;;  %v1503_v6 = vmul.f32 1.442695, %v1446_v63 }
 0x4a2   : > { %1551 = vadd.xlane.f32.xlu1 %v2333_v53  ;;  %1553 = vadd.xlane.f32.xlu0 %v2335_v54  ;;  %v3204_v49 = vpop.xlane.xlu0 %1409  ;;  %v3206_v44 = vpop.xlane.xlu1 %1411 }
 0x4a3   : > { %v2337_v59 = vpop.eup %2336  ;;  %2346 = vpow2.f32 %v1501_v0  ;;  %v1447_v50 = vsub.f32 %v3067_v9, %v3204_v49  ;;  %v1448_v1 = vsub.f32 %v3072_v10, %v3206_v44 }
 0x4a4   : > { %2348 = vpow2.f32 %v1503_v6 }
 0x4a5   : > { %v2339_v60 = vpop.eup %2338  ;;  %v1505_v2 = vmul.f32 1.442695, %v1447_v50  ;;  %v1507_v27 = vmul.f32 1.442695, %v1448_v1 }
 0x4a6   : > { %1555 = vadd.xlane.f32.xlu1 %v2337_v59  ;;  %1557 = vadd.xlane.f32.xlu0 %v2339_v60  ;;  %v3212_v53 = vpop.xlane.xlu0 %1413  ;;  %v3214_v48 = vpop.xlane.xlu1 %1415 }
 0x4a7   : > { %v2341_v63 = vpop.eup %2340  ;;  %2350 = vpow2.f32 %v1505_v2  ;;  %v1449_v54 = vsub.f32 %v3079_v11, %v3212_v53  ;;  %v1450_v9 = vsub.f32 %v3084_v12, %v3214_v48 }
 0x4a8   : > { %2352 = vpow2.f32 %v1507_v27 }
 0x4a9   : > { %v2343_v0 = vpop.eup %2342  ;;  %v1509_v10 = vmul.f32 1.442695, %v1449_v54  ;;  %v1511_v6 = vmul.f32 1.442695, %v1450_v9 }
 0x4aa   : > { %1559 = vadd.xlane.f32.xlu1 %v2341_v63  ;;  %1561 = vadd.xlane.f32.xlu0 %v2343_v0  ;;  %v3220_v59 = vpop.xlane.xlu0 %1417  ;;  %v3222_v50 = vpop.xlane.xlu1 %1419 }
 0x4ab   : > { %3365 = vst [vmem:[#allocation31_spill] sm:$0xff] %v3222_v50  ;;  %v2345_v1 = vpop.eup %2344  ;;  %2354 = vpow2.f32 %v1509_v10  ;;  %v1451_v60 = vsub.f32 %v3091_v15, %v3220_v59  ;;  %v1452_v11 = vsub.f32 %v3096_v4, %v3222_v50 }
 0x4ac   : > { %2356 = vpow2.f32 %v1511_v6 }
 0x4ad   : > { %v2347_v2 = vpop.eup %2346  ;;  %v1513_v12 = vmul.f32 1.442695, %v1451_v60  ;;  %v1515_v27 = vmul.f32 1.442695, %v1452_v11 }
 0x4ae   : > { %1563 = vadd.xlane.f32.xlu1 %v2345_v1  ;;  %1565 = vadd.xlane.f32.xlu0 %v2347_v2  ;;  %v2349_v63 = vpop.eup %2348 }
 0x4af   : > { %2358 = vpow2.f32 %v1513_v12 }
 0x4b0   : > { %2360 = vpow2.f32 %v1515_v27 }
 0x4b1   : > { %v2351_v54 = vpop.eup %2350 }
 0x4b2   : > { %1567 = vadd.xlane.f32.xlu1 %v2349_v63  ;;  %1569 = vadd.xlane.f32.xlu0 %v2351_v54  ;;  %v2353_v9 = vpop.eup %2352 }
 0x4b5   : > { %v2355_v0 = vpop.eup %2354 }
 0x4b6   : > { %1571 = vadd.xlane.f32.xlu1 %v2353_v9  ;;  %1573 = vadd.xlane.f32.xlu0 %v2355_v0  ;;  %v2357_v15 = vpop.eup %2356 }
 0x4b9   : > { %v2359_v10 = vpop.eup %2358 }
 0x4ba   : > { %1575 = vadd.xlane.f32.xlu1 %v2357_v15  ;;  %1577 = vadd.xlane.f32.xlu0 %v2359_v10  ;;  %v2361_v4 = vpop.eup %2360 }
 0x4be   : > { %1579 = vadd.xlane.f32.xlu1 %v2361_v4 }
 0x50b   : > { %v1518_v6 = vpop.xlane.xlu0 %1517 }
 0x50c   : > { %2362 = vlog2.f32 %v1518_v6 }
 0x50f   : > { %v1520_v1 = vpop.xlane.xlu1 %1519  ;;  %v1522_v60 = vpop.xlane.xlu0 %1521 }
 0x510   : > { %2364 = vlog2.f32 %v1520_v1 }
 0x511   : > { %2366 = vlog2.f32 %v1522_v60 }
 0x513   : > { %v1524_v11 = vpop.xlane.xlu1 %1523  ;;  %v1526_v2 = vpop.xlane.xlu0 %1525 }
 0x514   : > { %2368 = vlog2.f32 %v1524_v11 }
 0x515   : > { %2370 = vlog2.f32 %v1526_v2 }
 0x516   : > { %v2363_v12 = vpop.eup %2362 }
 0x517   : > { %v1582_v27 = vmul.f32 0.6931472, %v2363_v12  ;;  %v1528_v63 = vpop.xlane.xlu1 %1527  ;;  %v1530_v54 = vpop.xlane.xlu0 %1529 }
 0x518   : > { %2372 = vlog2.f32 %v1528_v63 }
 0x519   : > { %v1645_v9 = vadd.f32 %v1582_v27, %v3100_v40  ;;  %2374 = vlog2.f32 %v1530_v54 }
 0x51a   : > { %v2365_v0 = vpop.eup %2364 }
 0x51b   : > { %v2367_v15 = vpop.eup %2366  ;;  %v1677_v10 = vsub.f32 %v2808_v45, %v1645_v9  ;;  %v1584_v4 = vmul.f32 0.6931472, %v2365_v0  ;;  %v1532_v6 = vpop.xlane.xlu1 %1531 }
 0x51c   : > { %v1534_v1 = vpop.xlane.xlu0 %1533  ;;  %v1586_v60 = vmul.f32 0.6931472, %v2367_v15  ;;  %2376 = vlog2.f32 %v1532_v6 }
 0x51d   : > { %1709 = vst [vmem:[#allocation12] sm:$0xff] %v1677_v10  ;;  %v1646_v11 = vadd.f32 %v1584_v4, %v3108_v8  ;;  %2378 = vlog2.f32 %v1534_v1 }
 0x51e   : > { %v2369_v2 = vpop.eup %2368  ;;  %v1647_v12 = vadd.f32 %v1586_v60, %v3102_v24 }
 0x51f   : > { %v2371_v63 = vpop.eup %2370  ;;  %v1678_v40 = vsub.f32 %v2814_v57, %v1646_v11  ;;  %v1588_v27 = vmul.f32 0.6931472, %v2369_v2  ;;  %v1536_v54 = vpop.xlane.xlu1 %1535 }
 0x520   : > { %v1538_v50 = vpop.xlane.xlu0 %1537  ;;  %v1679_v45 = vsub.f32 %v2820_v5, %v1647_v12  ;;  %v1590_v9 = vmul.f32 0.6931472, %v2371_v63  ;;  %2380 = vlog2.f32 %v1536_v54 }
 0x521   : > { %1710 = vst [vmem:[#allocation12 + $0x8] sm:$0xff] %v1678_v40  ;;  %v1648_v0 = vadd.f32 %v1588_v27, %v3110_v16  ;;  %2382 = vlog2.f32 %v1538_v50 }
 0x522   : > { %v2373_v15 = vpop.eup %2372  ;;  %1711 = vst [vmem:[#allocation12 + $0x10] sm:$0xff] %v1679_v45  ;;  %v1649_v8 = vadd.f32 %v1590_v9, %v3116_v19 }
 0x523   : > { %v2375_v10 = vpop.eup %2374  ;;  %v1680_v24 = vsub.f32 %v2826_v17, %v1648_v0  ;;  %v1592_v4 = vmul.f32 0.6931472, %v2373_v15  ;;  %v1540_v57 = vpop.xlane.xlu1 %1539 }
 0x524   : > { %v1542_v6 = vpop.xlane.xlu0 %1541  ;;  %v1681_v1 = vsub.f32 %v2832_v29, %v1649_v8  ;;  %v1594_v60 = vmul.f32 0.6931472, %v2375_v10  ;;  %2384 = vlog2.f32 %v1540_v57 }
 0x525   : > { %1712 = vst [vmem:[#allocation12 + $0x18] sm:$0xff] %v1680_v24  ;;  %v1650_v5 = vadd.f32 %v1592_v4, %v3118_v18  ;;  %2386 = vlog2.f32 %v1542_v6 }
 0x526   : > { %v2377_v16 = vpop.eup %2376  ;;  %1713 = vst [vmem:[#allocation12 + $0x20] sm:$0xff] %v1681_v1  ;;  %v1651_v50 = vadd.f32 %v1594_v60, %v3124_v25 }
 0x527   : > { %v2379_v11 = vpop.eup %2378  ;;  %v1682_v19 = vsub.f32 %v2838_v41, %v1650_v5  ;;  %v1596_v2 = vmul.f32 0.6931472, %v2377_v16  ;;  %v1544_v17 = vpop.xlane.xlu1 %1543 }
 0x528   : > { %v1546_v12 = vpop.xlane.xlu0 %1545  ;;  %v1683_v63 = vsub.f32 %v2844_v55, %v1651_v50  ;;  %v1598_v40 = vmul.f32 0.6931472, %v2379_v11  ;;  %2388 = vlog2.f32 %v1544_v17 }
 0x529   : > { %1714 = vst [vmem:[#allocation12 + $0x28] sm:$0xff] %v1682_v19  ;;  %v1652_v29 = vadd.f32 %v1596_v2, %v3126_v26  ;;  %2390 = vlog2.f32 %v1546_v12 }
 0x52a   : > { %v2381_v18 = vpop.eup %2380  ;;  %1715 = vst [vmem:[#allocation12 + $0x30] sm:$0xff] %v1683_v63  ;;  %v1653_v27 = vadd.f32 %v1598_v40, %v3132_v28 }
 0x52b   : > { %v2383_v54 = vpop.eup %2382  ;;  %v1684_v25 = vsub.f32 %v2850_v7, %v1652_v29  ;;  %v1600_v45 = vmul.f32 0.6931472, %v2381_v18  ;;  %v1548_v41 = vpop.xlane.xlu1 %1547 }
 0x52c   : > { %v1550_v9 = vpop.xlane.xlu0 %1549  ;;  %v1685_v0 = vsub.f32 %v2856_v21, %v1653_v27  ;;  %v1602_v15 = vmul.f32 0.6931472, %v2383_v54  ;;  %2392 = vlog2.f32 %v1548_v41 }
 0x52d   : > { %1716 = vst [vmem:[#allocation12 + $0x38] sm:$0xff] %v1684_v25  ;;  %v1654_v55 = vadd.f32 %v1600_v45, %v3134_v30  ;;  %2394 = vlog2.f32 %v1550_v9 }
 0x52e   : > { %v2385_v26 = vpop.eup %2384  ;;  %1717 = vst [vmem:[#allocation12 + $0x40] sm:$0xff] %v1685_v0  ;;  %v1655_v8 = vadd.f32 %v1602_v15, %v3140_v20 }
 0x52f   : > { %v2387_v10 = vpop.eup %2386  ;;  %v1686_v28 = vsub.f32 %v2862_v35, %v1654_v55  ;;  %v1604_v24 = vmul.f32 0.6931472, %v2385_v26  ;;  %v1552_v7 = vpop.xlane.xlu1 %1551  ;;  %v3366_v55 = vld [vmem:[#allocation17_spill] sm:$0xff] }
 0x530   : > { %v1554_v4 = vpop.xlane.xlu0 %1553  ;;  %v1687_v57 = vsub.f32 %v2868_v51, %v1655_v8  ;;  %v1606_v6 = vmul.f32 0.6931472, %v2387_v10  ;;  %2396 = vlog2.f32 %v1552_v7 }
 0x531   : > { %1718 = vst [vmem:[#allocation12 + $0x48] sm:$0xff] %v1686_v28  ;;  %v1656_v21 = vadd.f32 %v1604_v24, %v3142_v56  ;;  %2398 = vlog2.f32 %v1554_v4 }
 0x532   : > { %v2389_v30 = vpop.eup %2388  ;;  %1719 = vst [vmem:[#allocation12 + $0x50] sm:$0xff] %v1687_v57  ;;  %v1657_v1 = vadd.f32 %v1606_v6, %v3148_v52  ;;  %v3368_v57 = vld [vmem:[#allocation19_spill] sm:$0xff] }
 0x533   : > { %v2391_v60 = vpop.eup %2390  ;;  %v1688_v20 = vsub.f32 %v2874_v3, %v1656_v21  ;;  %v1608_v5 = vmul.f32 0.6931472, %v2389_v30  ;;  %v1556_v35 = vpop.xlane.xlu1 %1555 }
 0x534   : > { %v1558_v16 = vpop.xlane.xlu0 %1557  ;;  %v1689_v50 = vsub.f32 %v2880_v23, %v1657_v1  ;;  %v1610_v11 = vmul.f32 0.6931472, %v2391_v60  ;;  %2400 = vlog2.f32 %v1556_v35 }
 0x535   : > { %1720 = vst [vmem:[#allocation12 + $0x58] sm:$0xff] %v1688_v20  ;;  %v1658_v51 = vadd.f32 %v1608_v5, %v3150_v36  ;;  %2402 = vlog2.f32 %v1558_v16 }
 0x536   : > { %v2393_v56 = vpop.eup %2392  ;;  %1721 = vst [vmem:[#allocation12 + $0x60] sm:$0xff] %v1689_v50  ;;  %v1659_v19 = vadd.f32 %v1610_v11, %v3156_v42  ;;  %v3370_v50 = vld [vmem:[#allocation21_spill] sm:$0xff] }
 0x537   : > { %v2395_v2 = vpop.eup %2394  ;;  %v1690_v52 = vsub.f32 %v2886_v39, %v1658_v51  ;;  %v1612_v17 = vmul.f32 0.6931472, %v2393_v56  ;;  %v1560_v3 = vpop.xlane.xlu1 %1559 }
 0x538   : > { %v1562_v12 = vpop.xlane.xlu0 %1561  ;;  %v1691_v63 = vsub.f32 %v2892_v61, %v1659_v19  ;;  %v1614_v40 = vmul.f32 0.6931472, %v2395_v2  ;;  %2404 = vlog2.f32 %v1560_v3 }
 0x539   : > { %1722 = vst [vmem:[#allocation12 + $0x68] sm:$0xff] %v1690_v52  ;;  %v1660_v23 = vadd.f32 %v1612_v17, %v3158_v22  ;;  %2406 = vlog2.f32 %v1562_v12  ;;  %v3372_v12 = vld [vmem:[#allocation23_spill] sm:$0xff] }
 0x53a   : > { %v2397_v36 = vpop.eup %2396  ;;  %1723 = vst [vmem:[#allocation12 + $0x70] sm:$0xff] %v1691_v63  ;;  %v1661_v29 = vadd.f32 %v1614_v40, %v3164_v31 }
 0x53b   : > { %v2399_v18 = vpop.eup %2398  ;;  %v1692_v42 = vsub.f32 %v2898_v13, %v1660_v23  ;;  %v1616_v27 = vmul.f32 0.6931472, %v2397_v36  ;;  %v1564_v39 = vpop.xlane.xlu1 %1563 }
 0x53c   : > { %v1566_v54 = vpop.xlane.xlu0 %1565  ;;  %v1693_v25 = vsub.f32 %v2810_v46, %v1661_v29  ;;  %v1618_v45 = vmul.f32 0.6931472, %v2399_v18  ;;  %2408 = vlog2.f32 %v1564_v39  ;;  %v3373_v18 = vld [vmem:[#allocation24_spill] sm:$0xff] }
 0x53d   : > { %1724 = vst [vmem:[#allocation12 + $0x78] sm:$0xff] %v1692_v42  ;;  %v1662_v61 = vadd.f32 %v1616_v27, %v3166_v62  ;;  %2410 = vlog2.f32 %v1566_v54  ;;  %v3374_v27 = vld [vmem:[#allocation25_spill] sm:$0xff] }
 0x53e   : > { %v2401_v22 = vpop.eup %2400  ;;  %1725 = vst [vmem:[#allocation12 + $0x80] sm:$0xff] %v1693_v25  ;;  %v1663_v41 = vadd.f32 %v1618_v45, %v3172_v33  ;;  %v3367_v33 = vld [vmem:[#allocation18_spill] sm:$0xff] }
 0x53f   : > { %v2403_v9 = vpop.eup %2402  ;;  %v1694_v31 = vsub.f32 %v2816_v58, %v1662_v61  ;;  %v1620_v0 = vmul.f32 0.6931472, %v2401_v22  ;;  %v1568_v13 = vpop.xlane.xlu1 %1567 }
 0x540   : > { %v1570_v15 = vpop.xlane.xlu0 %1569  ;;  %v1695_v26 = vsub.f32 %v3366_v55, %v1663_v41  ;;  %v1622_v8 = vmul.f32 0.6931472, %v2403_v9  ;;  %2412 = vlog2.f32 %v1568_v13 }
 0x541   : > { %1726 = vst [vmem:[#allocation12 + $0x88] sm:$0xff] %v1694_v31  ;;  %v1664_v46 = vadd.f32 %v1620_v0, %v3174_v14  ;;  %2414 = vlog2.f32 %v1570_v15  ;;  %v3376_v31 = vld [vmem:[#allocation27_spill] sm:$0xff] }
 0x542   : > { %v2405_v62 = vpop.eup %2404  ;;  %1727 = vst [vmem:[#allocation12 + $0x90] sm:$0xff] %v1695_v26  ;;  %v1665_v10 = vadd.f32 %v1622_v8, %v3180_v37  ;;  %v3369_v37 = vld [vmem:[#allocation20_spill] sm:$0xff] }
 0x543   : > { %v2407_v28 = vpop.eup %2406  ;;  %v1696_v24 = vsub.f32 %v3367_v33, %v1664_v46  ;;  %v1624_v7 = vmul.f32 0.6931472, %v2405_v62  ;;  %v1572_v58 = vpop.xlane.xlu1 %1571  ;;  %v3377_v26 = vld [vmem:[#allocation28_spill] sm:$0xff]  ;;  %v3378_v46 = vld [vmem:[#allocation29_spill] sm:$0xff] }
 0x544   : > { %v1574_v4 = vpop.xlane.xlu0 %1573  ;;  %v1697_v6 = vsub.f32 %v3368_v57, %v1665_v10  ;;  %v1626_v21 = vmul.f32 0.6931472, %v2407_v28  ;;  %2416 = vlog2.f32 %v1572_v58  ;;  %v3380_v28 = vld [vmem:[#allocation30_spill] sm:$0xff] }
 0x545   : > { %1728 = vst [vmem:[#allocation12 + $0x98] sm:$0xff] %v1696_v24  ;;  %v1666_v30 = vadd.f32 %v1624_v7, %v3182_v32  ;;  %2418 = vlog2.f32 %v1574_v4 }
 0x546   : > { %v2409_v14 = vpop.eup %2408  ;;  %1729 = vst [vmem:[#allocation12 + $0xa0] sm:$0xff] %v1697_v6  ;;  %v1667_v1 = vadd.f32 %v1626_v21, %v3188_v43  ;;  %v3371_v43 = vld [vmem:[#allocation22_spill] sm:$0xff] }
 0x547   : > { %v2411_v60 = vpop.eup %2410  ;;  %v1698_v20 = vsub.f32 %v3369_v37, %v1666_v30  ;;  %v1628_v5 = vmul.f32 0.6931472, %v2409_v14  ;;  %v1576_v35 = vpop.xlane.xlu1 %1575 }
 0x548   : > { %v1578_v16 = vpop.xlane.xlu0 %1577  ;;  %v1699_v11 = vsub.f32 %v3370_v50, %v1667_v1  ;;  %v1630_v51 = vmul.f32 0.6931472, %v2411_v60  ;;  %2420 = vlog2.f32 %v1576_v35 }
 0x549   : > { %1730 = vst [vmem:[#allocation12 + $0xa8] sm:$0xff] %v1698_v20  ;;  %v1668_v56 = vadd.f32 %v1628_v5, %v3190_v34  ;;  %2422 = vlog2.f32 %v1578_v16 }
 0x54a   : > { %v2413_v32 = vpop.eup %2412  ;;  %1731 = vst [vmem:[#allocation12 + $0xb0] sm:$0xff] %v1699_v11  ;;  %v1669_v19 = vadd.f32 %v1630_v51, %v3196_v47 }
 0x54b   : > { %v2415_v2 = vpop.eup %2414  ;;  %v1700_v52 = vsub.f32 %v3371_v43, %v1668_v56  ;;  %v1632_v17 = vmul.f32 0.6931472, %v2413_v32  ;;  %v1580_v3 = vpop.xlane.xlu1 %1579 }
 0x54c   : > { %v1701_v63 = vsub.f32 %v3372_v12, %v1669_v19  ;;  %v1634_v40 = vmul.f32 0.6931472, %v2415_v2  ;;  %2424 = vlog2.f32 %v1580_v3 }
 0x54d   : > { %1732 = vst [vmem:[#allocation12 + $0xb8] sm:$0xff] %v1700_v52  ;;  %v1670_v23 = vadd.f32 %v1632_v17, %v3198_v38  ;;  %v3375_v38 = vld [vmem:[#allocation26_spill] sm:$0xff] }
 0x54e   : > { %v2417_v36 = vpop.eup %2416  ;;  %1733 = vst [vmem:[#allocation12 + $0xc0] sm:$0xff] %v1701_v63  ;;  %v1671_v34 = vadd.f32 %v1634_v40, %v3204_v49 }
 0x54f   : > { %v2419_v29 = vpop.eup %2418  ;;  %v1702_v42 = vsub.f32 %v3373_v18, %v1670_v23  ;;  %v1636_v47 = vmul.f32 0.6931472, %v2417_v36 }
 0x550   : > { %v1703_v39 = vsub.f32 %v3374_v27, %v1671_v34  ;;  %v1638_v54 = vmul.f32 0.6931472, %v2419_v29 }
 0x551   : > { %1734 = vst [vmem:[#allocation12 + $0xc8] sm:$0xff] %v1702_v42  ;;  %v1672_v25 = vadd.f32 %v1636_v47, %v3206_v44 }
 0x552   : > { %v2421_v45 = vpop.eup %2420  ;;  %1735 = vst [vmem:[#allocation12 + $0xd0] sm:$0xff] %v1703_v39  ;;  %v1673_v61 = vadd.f32 %v1638_v54, %v3212_v53  ;;  %v3379_v53 = vld [vmem:[#allocation31_spill] sm:$0xff] }
 0x553   : > { %v2423_v22 = vpop.eup %2422  ;;  %v1704_v41 = vsub.f32 %v3375_v38, %v1672_v25  ;;  %v1640_v9 = vmul.f32 0.6931472, %v2421_v45 }
 0x554   : > { %v1705_v49 = vsub.f32 %v3376_v31, %v1673_v61  ;;  %v1642_v0 = vmul.f32 0.6931472, %v2423_v22 }
 0x555   : > { %1736 = vst [vmem:[#allocation12 + $0xd8] sm:$0xff] %v1704_v41  ;;  %v1674_v13 = vadd.f32 %v1640_v9, %v3214_v48 }
 0x556   : > { %v2425_v15 = vpop.eup %2424  ;;  %1737 = vst [vmem:[#allocation12 + $0xe0] sm:$0xff] %v1705_v49  ;;  %v1675_v55 = vadd.f32 %v1642_v0, %v3220_v59 }
 0x557   : > { %v1706_v44 = vsub.f32 %v3377_v26, %v1674_v13  ;;  %v1644_v8 = vmul.f32 0.6931472, %v2425_v15 }
 0x558   : > { %v1707_v62 = vsub.f32 %v3378_v46, %v1675_v55 }
 0x559   : > { %1738 = vst [vmem:[#allocation12 + $0xe8] sm:$0xff] %v1706_v44  ;;  %v1676_v10 = vadd.f32 %v1644_v8, %v3379_v53 }
 0x55a   : > { %1739 = vst [vmem:[#allocation12 + $0xf0] sm:$0xff] %v1707_v62 }
 0x55b   : > { %v1708_v33 = vsub.f32 %v3380_v28, %v1676_v10 }
 0x55d   : > { %1740 = vst [vmem:[#allocation12 + $0xf8] sm:$0xff] %v1708_v33 }
 0x55e PF: > { %p2276_p9 = scmp.eq.s32.totalorder %s2631_s16, 2  ;;  %s2597_s17 = smov [#allocation12]  }
 0x55f   : > { %s1747_s22 = sshll.u32 %s2597_s17, 4  ;;  %s1748_s22 = int_to_ptr.vmem [resolvable:$true] %s1747_s22 }
 0x560   : > { %s2538_s26 = scalar_lea.vmem %s1748_s22, 4096  ;;  %p2545_p12 = scmp.lt.s32.totalorder %s1748_s22, %s1748_s22 }
 0x561   : > { %p2539_p2 = scmp.ne.s32.totalorder %s1748_s22, %s2538_s26  ;;  %p2546_p13 = scmp.lt.s32.totalorder %s2538_s26, %s2538_s26 }
 0x563   : > { %p2540_p10 = pnand %p2539_p2, %p2276_p9  ;;  %p2547_p0 = por %p2546_p13, %p2545_p12 }
 0x565   : > { %p2541_p11 = pneg %p2540_p10 }
 0x567   : > { %p2548_p8 = pnand %p2547_p0, %p2541_p11 }
 0x569   : > { %2551 = shalt.err (!%p2548_p8)
}
 0x56a   : > { %s2552_s9 = scalar_lea.hbm %s3322_s4, 4096 }
 0x56b   : > { %p2553_p3 = scmp.ne.s32.totalorder %s3322_s4, %s2552_s9  ;;  %p2558_p6 = scmp.lt.u32.totalorder %s2552_s9, %s3322_s4 }
 0x56d   : > { %p2554_p4 = pnand %p2553_p3, %p2276_p9 }
 0x56f   : > { %p2555_p1 = pneg %p2554_p4 }
 0x571   : > { %p2560_p5 = pnand %p2558_p6, %p2555_p1 }
 0x573   : > { %2563 = shalt.err (!%p2560_p5)
}
 0x574   : > { %s2598_s18 = smov 128   ;;  %s2599_s20 = smov 8  }
 0x575   : > { %2252 = dma.vmem_to_hbm [thread:$0]  (%p2276_p9), %s1748_s22, 4096, %s3322_s4, [#allocation6], %s2598_s18, %s2598_s18, %s2599_s20  }
 0x576   : > { %2581 = dma.done.wait (%p2276_p9), [#allocation6], 4096  }
 0x577   : > { %2583 = vsyncadd (%p2276_p9), [#allocation6], 4294963200 }
 0x578 PF: > { %s18_s15 = sadd.s32 1, %s2586_s15  }
 0x579   : > { %p15_p7 = scmp.ge.s32.totalorder %s18_s15, 5  }
 0x57b   :  { %17 = sbr.rel (!%p15_p7) target bundleno = 4 (0x4), region = 85 }
 0x582   :  { %1763 = vsyncpa [#allocation5], 1 }
 0x583   :  { %1765 = vsyncpa [#allocation5 + $0x1], 1 }
 0x584   :  { %1766 = vsyncpa [#allocation8], 1 }
 0x585   :  { %1767 = vsyncpa [#allocation11], 1 }
 0x586   :  { %1768 = vsyncpa [#allocation6], 1 }
 0x587   :  { %1770 = vsyncpa [#allocation6 + $0x1], 1 }

</bundles_post_ra>
